<compile_context>
chip_gen: v7x
topology: tpu7x:2x2x1
jax: 0.10.0
libtpu: 0.0.40
codegen_flags: <defaults>
</compile_context>

<pallas_src>
import functools

import jax
import jax.numpy as jnp
import numpy as np
from jax.experimental import pallas as pl
from jax.experimental.pallas import tpu as pltpu


# ---------------------------------------------------------------------------
# In-kernel helpers
# ---------------------------------------------------------------------------
def _zero_halo(pad_ref, d):
    """Zero only the d-wide halo frame of a (Hp, Wp, C) padded VMEM scratch."""
    Hp, Wp, C = pad_ref.shape
    z_rows = jnp.zeros((d, Wp, C), pad_ref.dtype)
    pad_ref[:d, :, :] = z_rows                      # top rows
    pad_ref[Hp - d:, :, :] = z_rows                 # bottom rows
    z_cols = jnp.zeros((Hp - 2 * d, d, C), pad_ref.dtype)
    pad_ref[d:Hp - d, :d, :] = z_cols               # left cols
    pad_ref[d:Hp - d, Wp - d:, :] = z_cols          # right cols


def _dilated_conv3x3(pad_ref, w_ref, b_ref, d):
    """3x3 dilation-d 'same' conv on a channels-last padded scratch.

    pad_ref : (H2+2d, W2+2d, C)  f32 padded activation (halo already zero)
    w_ref   : (9*C, Cout)        BN-folded weights, rows ordered (ky, kx, c)
    b_ref   : (1, Cout)          f32 folded bias
    returns : (H2*W2, Cout)      f32, bias + ReLU applied
    """
    Hp, Wp, C = pad_ref.shape
    H2, W2 = Hp - 2 * d, Wp - 2 * d
    taps = [
        pad_ref[ky * d:ky * d + H2, kx * d:kx * d + W2, :].reshape(H2 * W2, C)
        for ky in range(3) for kx in range(3)
    ]
    if C < 128:
        # Small-C levels: one fused im2col GEMM (K = 9*C), MXU operands cast
        # to the (possibly bf16) weight dtype right before the dot.
        im2col = jnp.concatenate(taps, axis=1).astype(w_ref.dtype)  # (M, 9C)
        y = jnp.dot(im2col, w_ref[...], preferred_element_type=jnp.float32)
    else:
        # Deep levels: 9 accumulating per-tap GEMMs -- never materialize the
        # 9x-activation-sized im2col temp (dominant VMEM consumer on v7x).
        y = jnp.zeros((H2 * W2, w_ref.shape[-1]), jnp.float32)
        for t, tap in enumerate(taps):
            y = y + jnp.dot(tap.astype(w_ref.dtype),
                            w_ref[t * C:(t + 1) * C, :],
                            preferred_element_type=jnp.float32)
    return jnp.maximum(y + b_ref[...], 0.0)         # f32 epilogue (VPU-safe)


# ---------------------------------------------------------------------------
# Fused kernel: maxpool(2) -> conv3x3(d1)+BN+ReLU -> conv3x3(d2)+BN+ReLU
# ---------------------------------------------------------------------------
def down_fused_kernel(x_ref, w1_ref, b1_ref, w2_ref, b2_ref, o_ref,
                      pad1_ref, pad2_ref, *, dil1, dil2):
    # x_ref   : (1, H, W, Cin)            NHWC input tile (one batch element)
    # w1_ref  : (9*Cin, Cmid)             conv1 weights, BN-folded
    # b1_ref  : (1, Cmid)                 conv1 folded bias (f32)
    # w2_ref  : (9*Cmid, Cout)            conv2 weights, BN-folded
    # b2_ref  : (1, Cout)                 conv2 folded bias (f32)
    # o_ref   : (1, Cout, H2*W2)          lane-dense output (spatial on lanes)
    # pad1_ref: (H2+2*d1, W2+2*d1, Cin)   VMEM "same"-pad scratch
    # pad2_ref: (H2+2*d2, W2+2*d2, Cmid)  VMEM "same"-pad scratch
    _, H, W, Cin = x_ref.shape
    H2, W2 = H // 2, W // 2
    d1, d2 = dil1, dil2
    Cmid = pad2_ref.shape[-1]

    # Zero only the halo frame; the interior is fully rewritten every step.
    _zero_halo(pad1_ref, d1)
    _zero_halo(pad2_ref, d2)

    # ---- MaxPool2d(2): pooling pairs land on leading axes (cheap reshapes) -
    xv = x_ref[0]                                               # (H, W, Cin)
    hpool = jnp.max(xv.reshape(H2, 2, W, Cin), axis=1)          # (H2, W, Cin)
    pooled = jnp.max(hpool.reshape(H2 * W2, 2, Cin), axis=1)    # (H2*W2, Cin)

    # ---- conv1: 3x3, dilation d1, padding d1 ("same") + BN + ReLU ----------
    pad1_ref[d1:d1 + H2, d1:d1 + W2, :] = (
        pooled.reshape(H2, W2, Cin).astype(pad1_ref.dtype))
    y1 = _dilated_conv3x3(pad1_ref, w1_ref, b1_ref, d1)         # (H2*W2, Cmid)

    # ---- conv2: 3x3, dilation d2, padding d2 ("same") + BN + ReLU ----------
    pad2_ref[d2:d2 + H2, d2:d2 + W2, :] = (
        y1.reshape(H2, W2, Cmid).astype(pad2_ref.dtype))
    y2 = _dilated_conv3x3(pad2_ref, w2_ref, b2_ref, d2)         # (H2*W2, Cout)

    # ---- lane-dense store: spatial (H2*W2) on the lane axis ----------------
    o_ref[0] = y2.T.astype(o_ref.dtype)                         # (Cout, H2*W2)


# ---------------------------------------------------------------------------
# Wrapper / parameter folding
# ---------------------------------------------------------------------------
def fold_bn_into_conv(w, b, gamma, beta, mean, var, eps=1e-5):
    """Fold eval-mode BatchNorm (+ conv bias) into conv weights/bias (in f32)."""
    scale = gamma.astype(jnp.float32) / jnp.sqrt(var.astype(jnp.float32) + eps)
    w_f = w.astype(jnp.float32) * scale             # per-out-channel scale
    b_f = (b.astype(jnp.float32) - mean) * scale + beta
    return w_f, b_f


def down_forward(x_nchw, p, *, use_bf16_mxu=False):
    """down(in_ch, out_ch).forward -- NCHW in / NCHW out like PyTorch."""
    N, Cin, H, W = x_nchw.shape
    H2, W2 = H // 2, W // 2
    Cmid = p["w1"].shape[-1]
    Cout = p["w2"].shape[-1]
    d1, d2 = 2, 3

    # MaxPool2d(2) floors odd spatial dims (PyTorch behaviour): crop first.
    x_nchw = x_nchw[:, :, :2 * H2, :2 * W2]
    x = jnp.transpose(x_nchw, (0, 2, 3, 1)).astype(jnp.float32)   # NCHW -> NHWC

    # Fold BN in f32 first, cast to the MXU dtype afterwards.
    w1f, b1f = fold_bn_into_conv(p["w1"], p["b1"], p["gamma1"], p["beta1"],
                                 p["mean1"], p["var1"])
    w2f, b2f = fold_bn_into_conv(p["w2"], p["b2"], p["gamma2"], p["beta2"],
                                 p["mean2"], p["var2"])
    mxu_dtype = jnp.bfloat16 if use_bf16_mxu else jnp.float32
    w1m = w1f.reshape(9 * Cin, Cmid).astype(mxu_dtype)   # rows ordered (ky,kx,ci)
    w2m = w2f.reshape(9 * Cmid, Cout).astype(mxu_dtype)
    b1m = b1f.reshape(1, Cmid)                           # f32 epilogue
    b2m = b2f.reshape(1, Cout)
    itm = jnp.dtype(mxu_dtype).itemsize

    # Advisory cost estimate: lets XLA overlap neighbours with the fused call.
    flops = 2 * N * H2 * W2 * 9 * (Cin * Cmid + Cmid * Cout)
    bytes_accessed = int(x.size * 4 + (w1m.size + w2m.size) * itm
                         + (b1m.size + b2m.size) * 4 + N * Cout * H2 * W2 * 4)

    # Explicit scoped-VMEM budget (v5e default is only 16 MiB of 128 MiB).
    vmem_est = int(
        2 * (2 * H2) * (2 * W2) * Cin * 4                  # input block x2 bufs
        + 2 * Cout * H2 * W2 * 4                           # output block x2 bufs
        + 2 * (w1m.size + w2m.size) * itm + 4 * (b1m.size + b2m.size) * 4
        + ((H2 + 2 * d1) * (W2 + 2 * d1) * Cin
           + (H2 + 2 * d2) * (W2 + 2 * d2) * Cmid) * 4     # pad scratches
        + 9 * (Cin + Cmid) * H2 * W2 * 4                   # im2col temporaries
    )
    vmem_limit = int(min(max(2 * vmem_est, 32 << 20), 64 << 20))

    kernel = functools.partial(down_fused_kernel, dil1=d1, dil2=d2)
    y = pl.pallas_call(
        kernel,
        out_shape=jax.ShapeDtypeStruct((N, Cout, H2 * W2), jnp.float32),
        grid=(N,),
        in_specs=[
            pl.BlockSpec((1, 2 * H2, 2 * W2, Cin), lambda n: (n, 0, 0, 0)),
            pl.BlockSpec((9 * Cin, Cmid), lambda n: (0, 0)),
            pl.BlockSpec((1, Cmid), lambda n: (0, 0)),
            pl.BlockSpec((9 * Cmid, Cout), lambda n: (0, 0)),
            pl.BlockSpec((1, Cout), lambda n: (0, 0)),
        ],
        out_specs=pl.BlockSpec((1, Cout, H2 * W2), lambda n: (n, 0, 0)),
        scratch_shapes=[
            pltpu.VMEM((H2 + 2 * d1, W2 + 2 * d1, Cin), jnp.float32),
            pltpu.VMEM((H2 + 2 * d2, W2 + 2 * d2, Cmid), jnp.float32),
        ],
        compiler_params=pltpu.CompilerParams(
            dimension_semantics=("parallel",),      # batch sharded across TCs
            vmem_limit_bytes=vmem_limit),
        cost_estimate=pl.CostEstimate(flops=flops, transcendentals=0,
                                      bytes_accessed=bytes_accessed),
    )(x, w1m, b1m, w2m, b2m)

    # (N, Cout, H2*W2) -> NCHW is a free reshape (no output transpose needed).
    return y.reshape(N, Cout, H2, W2)


# ---------------------------------------------------------------------------
# Pure-JAX reference (for correctness check)
# ---------------------------------------------------------------------------
def reference(x_nchw, p):
    x = jnp.transpose(x_nchw, (0, 2, 3, 1))
    x = jax.lax.reduce_window(x, -jnp.inf, jax.lax.max,
                              (1, 2, 2, 1), (1, 2, 2, 1), "VALID")

    def conv(x, w, b, gamma, beta, mean, var, d):
        y = jax.lax.conv_general_dilated(
            x, w, window_strides=(1, 1), padding=[(d, d), (d, d)],
            rhs_dilation=(d, d), dimension_numbers=("NHWC", "HWIO", "NHWC")) + b
        y = (y - mean) / jnp.sqrt(var + 1e-5) * gamma + beta
        return jnp.maximum(y, 0.0)

    x = conv(x, p["w1"], p["b1"], p["gamma1"], p["beta1"], p["mean1"], p["var1"], 2)
    x = conv(x, p["w2"], p["b2"], p["gamma2"], p["beta2"], p["mean2"], p["var2"], 3)
    return jnp.transpose(x, (0, 3, 1, 2))


# ---------------------------------------------------------------------------
if __name__ == "__main__":
    key = jax.random.PRNGKey(0)
    N, in_ch, out_ch, H, W = 2, 4, 8, 16, 16
    ks = jax.random.split(key, 12)

    x = jax.random.normal(ks[0], (N, in_ch, H, W), jnp.float32)

    params = {
        # double_conv: Conv2d(in_ch, in_ch, 3, padding=2, dilation=2) + BN(in_ch)
        "w1": jax.random.normal(ks[1], (3, 3, in_ch, in_ch), jnp.float32) * 0.2,
        "b1": jax.random.normal(ks[2], (in_ch,), jnp.float32) * 0.1,
        "gamma1": 1.0 + 0.1 * jax.random.normal(ks[3], (in_ch,), jnp.float32),
        "beta1": 0.1 * jax.random.normal(ks[4], (in_ch,), jnp.float32),
        "mean1": 0.1 * jax.random.normal(ks[5], (in_ch,), jnp.float32),
        "var1": 0.5 + 0.1 * jnp.abs(jax.random.normal(ks[6], (in_ch,), jnp.float32)),
        # Conv2d(in_ch, out_ch, 3, padding=3, dilation=3) + BN(out_ch)
        "w2": jax.random.normal(ks[7], (3, 3, in_ch, out_ch), jnp.float32) * 0.2,
        "b2": jax.random.normal(ks[8], (out_ch,), jnp.float32) * 0.1,
        "gamma2": 1.0 + 0.1 * jax.random.normal(ks[9], (out_ch,), jnp.float32),
        "beta2": 0.1 * jax.random.normal(ks[10], (out_ch,), jnp.float32),
        "mean2": 0.1 * jax.random.normal(ks[11], (out_ch,), jnp.float32),
        "var2": jnp.ones((out_ch,), jnp.float32),
    }

    ref = jax.block_until_ready(reference(x, params))

    # f32 MXU path (exact same semantics as the PyTorch module in eval mode).
    out = jax.block_until_ready(down_forward(x, params, use_bf16_mxu=False))
    assert out.shape == (N, out_ch, H // 2, W // 2), out.shape
    np.testing.assert_allclose(np.asarray(out), np.asarray(ref),
                               rtol=1e-4, atol=1e-4)

    # bf16 MXU-operand path (v6e/v7x throughput option) -- looser tolerance.
    out_bf16 = jax.block_until_ready(down_forward(x, params, use_bf16_mxu=True))
    np.testing.assert_allclose(np.asarray(out_bf16), np.asarray(ref),
                               rtol=5e-2, atol=1e-1)

    print("KERNEL_OK")
</pallas_src>

<mosaic_0001>
module attributes {stable_mosaic.version = 11 : i64} {
  func.func @down_fused_kernel(%arg0: i32, %arg1: memref<1x16x16x4xf32, #tpu.memory_space<vmem>>, %arg2: memref<36x4xf32, #tpu.memory_space<vmem>>, %arg3: memref<1x4xf32, #tpu.memory_space<vmem>>, %arg4: memref<36x8xf32, #tpu.memory_space<vmem>>, %arg5: memref<1x8xf32, #tpu.memory_space<vmem>>, %arg6: memref<1x8x64xf32, #tpu.memory_space<vmem>>, %arg7: memref<12x12x4xf32, #tpu.memory_space<vmem>>, %arg8: memref<14x14x4xf32, #tpu.memory_space<vmem>>) attributes {dimension_semantics = [#tpu.dimension_semantics<parallel>], iteration_bounds = array<i64: 2>, scalar_prefetch = 0 : i64, scratch_operands = 2 : i64, tpu.core_type = #tpu.core_type<tc>, window_params = [{transform_indices = @transform_0, window_bounds = array<i64: 1, 16, 16, 4>}, {pipeline_mode = #tpu.pipeline_mode<synchronous>, transform_indices = @transform_1, window_bounds = array<i64: 36, 4>}, {pipeline_mode = #tpu.pipeline_mode<synchronous>, transform_indices = @transform_2, window_bounds = array<i64: 1, 4>}, {pipeline_mode = #tpu.pipeline_mode<synchronous>, transform_indices = @transform_3, window_bounds = array<i64: 36, 8>}, {pipeline_mode = #tpu.pipeline_mode<synchronous>, transform_indices = @transform_4, window_bounds = array<i64: 1, 8>}, {transform_indices = @transform_5, window_bounds = array<i64: 1, 8, 64>}]} {
    %cst = arith.constant 0.000000e+00 : f32
    %0 = vector.broadcast %cst : f32 to vector<2x12x4xf32>
    %c0 = arith.constant 0 : index
    %c0_0 = arith.constant 0 : index
    %c0_1 = arith.constant 0 : index
    %1 = vector.load %arg7[%c0, %c0_0, %c0_1] : memref<12x12x4xf32, #tpu.memory_space<vmem>>, vector<2x12x4xf32>
    tpu.vector_store %arg7[%c0, %c0_0, %c0_1], %0 {strides = array<i32>} : memref<12x12x4xf32, #tpu.memory_space<vmem>>, vector<2x12x4xf32>,
    %c10 = arith.constant 10 : index
    %c0_2 = arith.constant 0 : index
    %c0_3 = arith.constant 0 : index
    %2 = vector.load %arg7[%c10, %c0_2, %c0_3] : memref<12x12x4xf32, #tpu.memory_space<vmem>>, vector<2x12x4xf32>
    tpu.vector_store %arg7[%c10, %c0_2, %c0_3], %0 {strides = array<i32>} : memref<12x12x4xf32, #tpu.memory_space<vmem>>, vector<2x12x4xf32>,
    %cst_4 = arith.constant 0.000000e+00 : f32
    %3 = vector.broadcast %cst_4 : f32 to vector<8x2x4xf32>
    %c2 = arith.constant 2 : index
    %c0_5 = arith.constant 0 : index
    %c0_6 = arith.constant 0 : index
    %4 = vector.load %arg7[%c2, %c0_5, %c0_6] : memref<12x12x4xf32, #tpu.memory_space<vmem>>, vector<8x2x4xf32>
    tpu.vector_store %arg7[%c2, %c0_5, %c0_6], %3 {strides = array<i32>} : memref<12x12x4xf32, #tpu.memory_space<vmem>>, vector<8x2x4xf32>,
    %c2_7 = arith.constant 2 : index
    %c10_8 = arith.constant 10 : index
    %c0_9 = arith.constant 0 : index
    %5 = vector.load %arg7[%c2_7, %c10_8, %c0_9] : memref<12x12x4xf32, #tpu.memory_space<vmem>>, vector<8x2x4xf32>
    tpu.vector_store %arg7[%c2_7, %c10_8, %c0_9], %3 {strides = array<i32>} : memref<12x12x4xf32, #tpu.memory_space<vmem>>, vector<8x2x4xf32>,
    %cst_10 = arith.constant 0.000000e+00 : f32
    %6 = vector.broadcast %cst_10 : f32 to vector<3x14x4xf32>
    %c0_11 = arith.constant 0 : index
    %c0_12 = arith.constant 0 : index
    %c0_13 = arith.constant 0 : index
    %7 = vector.load %arg8[%c0_11, %c0_12, %c0_13] : memref<14x14x4xf32, #tpu.memory_space<vmem>>, vector<3x14x4xf32>
    tpu.vector_store %arg8[%c0_11, %c0_12, %c0_13], %6 {strides = array<i32>} : memref<14x14x4xf32, #tpu.memory_space<vmem>>, vector<3x14x4xf32>,
    %c11 = arith.constant 11 : index
    %c0_14 = arith.constant 0 : index
    %c0_15 = arith.constant 0 : index
    %8 = vector.load %arg8[%c11, %c0_14, %c0_15] : memref<14x14x4xf32, #tpu.memory_space<vmem>>, vector<3x14x4xf32>
    tpu.vector_store %arg8[%c11, %c0_14, %c0_15], %6 {strides = array<i32>} : memref<14x14x4xf32, #tpu.memory_space<vmem>>, vector<3x14x4xf32>,
    %cst_16 = arith.constant 0.000000e+00 : f32
    %9 = vector.broadcast %cst_16 : f32 to vector<8x3x4xf32>
    %c3 = arith.constant 3 : index
    %c0_17 = arith.constant 0 : index
    %c0_18 = arith.constant 0 : index
    %10 = vector.load %arg8[%c3, %c0_17, %c0_18] : memref<14x14x4xf32, #tpu.memory_space<vmem>>, vector<8x3x4xf32>
    tpu.vector_store %arg8[%c3, %c0_17, %c0_18], %9 {strides = array<i32>} : memref<14x14x4xf32, #tpu.memory_space<vmem>>, vector<8x3x4xf32>,
    %c3_19 = arith.constant 3 : index
    %c11_20 = arith.constant 11 : index
    %c0_21 = arith.constant 0 : index
    %11 = vector.load %arg8[%c3_19, %c11_20, %c0_21] : memref<14x14x4xf32, #tpu.memory_space<vmem>>, vector<8x3x4xf32>
    tpu.vector_store %arg8[%c3_19, %c11_20, %c0_21], %9 {strides = array<i32>} : memref<14x14x4xf32, #tpu.memory_space<vmem>>, vector<8x3x4xf32>,
    %c0_22 = arith.constant 0 : index
    %c0_23 = arith.constant 0 : index
    %c0_24 = arith.constant 0 : index
    %c0_25 = arith.constant 0 : index
    %12 = vector.load %arg1[%c0_22, %c0_23, %c0_24, %c0_25] : memref<1x16x16x4xf32, #tpu.memory_space<vmem>>, vector<1x16x16x4xf32>
    %13 = vector.shape_cast %12 : vector<1x16x16x4xf32> to vector<16x16x4xf32>
    %14 = vector.shape_cast %13 : vector<16x16x4xf32> to vector<8x2x16x4xf32>
    %cst_26 = arith.constant dense<0xFF800000> : vector<8x16x4xf32>
    %15 = vector.multi_reduction <maximumf>, %14, %cst_26 [1] : vector<8x2x16x4xf32> to vector<8x16x4xf32>
    %16 = vector.shape_cast %15 : vector<8x16x4xf32> to vector<64x2x4xf32>
    %cst_27 = arith.constant dense<0xFF800000> : vector<64x4xf32>
    %17 = vector.multi_reduction <maximumf>, %16, %cst_27 [1] : vector<64x2x4xf32> to vector<64x4xf32>
    %18 = vector.shape_cast %17 : vector<64x4xf32> to vector<8x8x4xf32>
    %c2_28 = arith.constant 2 : index
    %c2_29 = arith.constant 2 : index
    %c0_30 = arith.constant 0 : index
    %19 = vector.load %arg7[%c2_28, %c2_29, %c0_30] : memref<12x12x4xf32, #tpu.memory_space<vmem>>, vector<8x8x4xf32>
    tpu.vector_store %arg7[%c2_28, %c2_29, %c0_30], %18 {strides = array<i32>} : memref<12x12x4xf32, #tpu.memory_space<vmem>>, vector<8x8x4xf32>,
    %c0_31 = arith.constant 0 : index
    %c0_32 = arith.constant 0 : index
    %c0_33 = arith.constant 0 : index
    %20 = vector.load %arg7[%c0_31, %c0_32, %c0_33] : memref<12x12x4xf32, #tpu.memory_space<vmem>>, vector<8x8x4xf32>
    %21 = vector.shape_cast %20 : vector<8x8x4xf32> to vector<64x4xf32>
    %c0_34 = arith.constant 0 : index
    %c2_35 = arith.constant 2 : index
    %c0_36 = arith.constant 0 : index
    %22 = vector.load %arg7[%c0_34, %c2_35, %c0_36] : memref<12x12x4xf32, #tpu.memory_space<vmem>>, vector<8x8x4xf32>
    %23 = vector.shape_cast %22 : vector<8x8x4xf32> to vector<64x4xf32>
    %c0_37 = arith.constant 0 : index
    %c4 = arith.constant 4 : index
    %c0_38 = arith.constant 0 : index
    %24 = vector.load %arg7[%c0_37, %c4, %c0_38] : memref<12x12x4xf32, #tpu.memory_space<vmem>>, vector<8x8x4xf32>
    %25 = vector.shape_cast %24 : vector<8x8x4xf32> to vector<64x4xf32>
    %c2_39 = arith.constant 2 : index
    %c0_40 = arith.constant 0 : index
    %c0_41 = arith.constant 0 : index
    %26 = vector.load %arg7[%c2_39, %c0_40, %c0_41] : memref<12x12x4xf32, #tpu.memory_space<vmem>>, vector<8x8x4xf32>
    %27 = vector.shape_cast %26 : vector<8x8x4xf32> to vector<64x4xf32>
    %c2_42 = arith.constant 2 : index
    %c2_43 = arith.constant 2 : index
    %c0_44 = arith.constant 0 : index
    %28 = vector.load %arg7[%c2_42, %c2_43, %c0_44] : memref<12x12x4xf32, #tpu.memory_space<vmem>>, vector<8x8x4xf32>
    %29 = vector.shape_cast %28 : vector<8x8x4xf32> to vector<64x4xf32>
    %c2_45 = arith.constant 2 : index
    %c4_46 = arith.constant 4 : index
    %c0_47 = arith.constant 0 : index
    %30 = vector.load %arg7[%c2_45, %c4_46, %c0_47] : memref<12x12x4xf32, #tpu.memory_space<vmem>>, vector<8x8x4xf32>
    %31 = vector.shape_cast %30 : vector<8x8x4xf32> to vector<64x4xf32>
    %c4_48 = arith.constant 4 : index
    %c0_49 = arith.constant 0 : index
    %c0_50 = arith.constant 0 : index
    %32 = vector.load %arg7[%c4_48, %c0_49, %c0_50] : memref<12x12x4xf32, #tpu.memory_space<vmem>>, vector<8x8x4xf32>
    %33 = vector.shape_cast %32 : vector<8x8x4xf32> to vector<64x4xf32>
    %c4_51 = arith.constant 4 : index
    %c2_52 = arith.constant 2 : index
    %c0_53 = arith.constant 0 : index
    %34 = vector.load %arg7[%c4_51, %c2_52, %c0_53] : memref<12x12x4xf32, #tpu.memory_space<vmem>>, vector<8x8x4xf32>
    %35 = vector.shape_cast %34 : vector<8x8x4xf32> to vector<64x4xf32>
    %c4_54 = arith.constant 4 : index
    %c4_55 = arith.constant 4 : index
    %c0_56 = arith.constant 0 : index
    %36 = vector.load %arg7[%c4_54, %c4_55, %c0_56] : memref<12x12x4xf32, #tpu.memory_space<vmem>>, vector<8x8x4xf32>
    %37 = vector.shape_cast %36 : vector<8x8x4xf32> to vector<64x4xf32>
    %38 = tpu.concatenate %21, %23, %25, %27, %29, %31, %33, %35, %37 in 1 : vector<64x4xf32>, vector<64x4xf32>, vector<64x4xf32>, vector<64x4xf32>, vector<64x4xf32>, vector<64x4xf32>, vector<64x4xf32>, vector<64x4xf32>, vector<64x4xf32> -> vector<64x36xf32>
    %c0_57 = arith.constant 0 : index
    %c0_58 = arith.constant 0 : index
    %39 = vector.load %arg2[%c0_57, %c0_58] : memref<36x4xf32, #tpu.memory_space<vmem>>, vector<36x4xf32>
    %cst_59 = arith.constant dense<0.000000e+00> : vector<64x4xf32>
    %40 = tpu.matmul %38, %39, %cst_59 {dimension_numbers = #tpu.dot_dimension_numbers<[1], [0], [0], [1], [0, 0, 1, 1], [], []>} : vector<64x36xf32>, vector<36x4xf32>, vector<64x4xf32> -> vector<64x4xf32>
    %c0_60 = arith.constant 0 : index
    %c0_61 = arith.constant 0 : index
    %41 = vector.load %arg3[%c0_60, %c0_61] : memref<1x4xf32, #tpu.memory_space<vmem>>, vector<1x4xf32>
    %42 = vector.broadcast %41 : vector<1x4xf32> to vector<64x4xf32>
    %43 = arith.addf %40, %42 : vector<64x4xf32>
    %cst_62 = arith.constant 0.000000e+00 : f32
    %44 = vector.broadcast %cst_62 : f32 to vector<64x4xf32>
    %45 = arith.maximumf %43, %44 : vector<64x4xf32>
    %46 = vector.shape_cast %45 : vector<64x4xf32> to vector<8x8x4xf32>
    %c3_63 = arith.constant 3 : index
    %c3_64 = arith.constant 3 : index
    %c0_65 = arith.constant 0 : index
    %47 = vector.load %arg8[%c3_63, %c3_64, %c0_65] : memref<14x14x4xf32, #tpu.memory_space<vmem>>, vector<8x8x4xf32>
    tpu.vector_store %arg8[%c3_63, %c3_64, %c0_65], %46 {strides = array<i32>} : memref<14x14x4xf32, #tpu.memory_space<vmem>>, vector<8x8x4xf32>,
    %c0_66 = arith.constant 0 : index
    %c0_67 = arith.constant 0 : index
    %c0_68 = arith.constant 0 : index
    %48 = vector.load %arg8[%c0_66, %c0_67, %c0_68] : memref<14x14x4xf32, #tpu.memory_space<vmem>>, vector<8x8x4xf32>
    %49 = vector.shape_cast %48 : vector<8x8x4xf32> to vector<64x4xf32>
    %c0_69 = arith.constant 0 : index
    %c3_70 = arith.constant 3 : index
    %c0_71 = arith.constant 0 : index
    %50 = vector.load %arg8[%c0_69, %c3_70, %c0_71] : memref<14x14x4xf32, #tpu.memory_space<vmem>>, vector<8x8x4xf32>
    %51 = vector.shape_cast %50 : vector<8x8x4xf32> to vector<64x4xf32>
    %c0_72 = arith.constant 0 : index
    %c6 = arith.constant 6 : index
    %c0_73 = arith.constant 0 : index
    %52 = vector.load %arg8[%c0_72, %c6, %c0_73] : memref<14x14x4xf32, #tpu.memory_space<vmem>>, vector<8x8x4xf32>
    %53 = vector.shape_cast %52 : vector<8x8x4xf32> to vector<64x4xf32>
    %c3_74 = arith.constant 3 : index
    %c0_75 = arith.constant 0 : index
    %c0_76 = arith.constant 0 : index
    %54 = vector.load %arg8[%c3_74, %c0_75, %c0_76] : memref<14x14x4xf32, #tpu.memory_space<vmem>>, vector<8x8x4xf32>
    %55 = vector.shape_cast %54 : vector<8x8x4xf32> to vector<64x4xf32>
    %c3_77 = arith.constant 3 : index
    %c3_78 = arith.constant 3 : index
    %c0_79 = arith.constant 0 : index
    %56 = vector.load %arg8[%c3_77, %c3_78, %c0_79] : memref<14x14x4xf32, #tpu.memory_space<vmem>>, vector<8x8x4xf32>
    %57 = vector.shape_cast %56 : vector<8x8x4xf32> to vector<64x4xf32>
    %c3_80 = arith.constant 3 : index
    %c6_81 = arith.constant 6 : index
    %c0_82 = arith.constant 0 : index
    %58 = vector.load %arg8[%c3_80, %c6_81, %c0_82] : memref<14x14x4xf32, #tpu.memory_space<vmem>>, vector<8x8x4xf32>
    %59 = vector.shape_cast %58 : vector<8x8x4xf32> to vector<64x4xf32>
    %c6_83 = arith.constant 6 : index
    %c0_84 = arith.constant 0 : index
    %c0_85 = arith.constant 0 : index
    %60 = vector.load %arg8[%c6_83, %c0_84, %c0_85] : memref<14x14x4xf32, #tpu.memory_space<vmem>>, vector<8x8x4xf32>
    %61 = vector.shape_cast %60 : vector<8x8x4xf32> to vector<64x4xf32>
    %c6_86 = arith.constant 6 : index
    %c3_87 = arith.constant 3 : index
    %c0_88 = arith.constant 0 : index
    %62 = vector.load %arg8[%c6_86, %c3_87, %c0_88] : memref<14x14x4xf32, #tpu.memory_space<vmem>>, vector<8x8x4xf32>
    %63 = vector.shape_cast %62 : vector<8x8x4xf32> to vector<64x4xf32>
    %c6_89 = arith.constant 6 : index
    %c6_90 = arith.constant 6 : index
    %c0_91 = arith.constant 0 : index
    %64 = vector.load %arg8[%c6_89, %c6_90, %c0_91] : memref<14x14x4xf32, #tpu.memory_space<vmem>>, vector<8x8x4xf32>
    %65 = vector.shape_cast %64 : vector<8x8x4xf32> to vector<64x4xf32>
    %66 = tpu.concatenate %49, %51, %53, %55, %57, %59, %61, %63, %65 in 1 : vector<64x4xf32>, vector<64x4xf32>, vector<64x4xf32>, vector<64x4xf32>, vector<64x4xf32>, vector<64x4xf32>, vector<64x4xf32>, vector<64x4xf32>, vector<64x4xf32> -> vector<64x36xf32>
    %c0_92 = arith.constant 0 : index
    %c0_93 = arith.constant 0 : index
    %67 = vector.load %arg4[%c0_92, %c0_93] : memref<36x8xf32, #tpu.memory_space<vmem>>, vector<36x8xf32>
    %cst_94 = arith.constant dense<0.000000e+00> : vector<64x8xf32>
    %68 = tpu.matmul %66, %67, %cst_94 {dimension_numbers = #tpu.dot_dimension_numbers<[1], [0], [0], [1], [0, 0, 1, 1], [], []>} : vector<64x36xf32>, vector<36x8xf32>, vector<64x8xf32> -> vector<64x8xf32>
    %c0_95 = arith.constant 0 : index
    %c0_96 = arith.constant 0 : index
    %69 = vector.load %arg5[%c0_95, %c0_96] : memref<1x8xf32, #tpu.memory_space<vmem>>, vector<1x8xf32>
    %70 = vector.broadcast %69 : vector<1x8xf32> to vector<64x8xf32>
    %71 = arith.addf %68, %70 : vector<64x8xf32>
    %cst_97 = arith.constant 0.000000e+00 : f32
    %72 = vector.broadcast %cst_97 : f32 to vector<64x8xf32>
    %73 = arith.maximumf %71, %72 : vector<64x8xf32>
    %74 = tpu.transpose %73, [1, 0] : vector<64x8xf32> -> vector<8x64xf32>
    %c0_98 = arith.constant 0 : index
    %c0_99 = arith.constant 0 : index
    %c0_100 = arith.constant 0 : index
    %75 = vector.load %arg6[%c0_98, %c0_99, %c0_100] : memref<1x8x64xf32, #tpu.memory_space<vmem>>, vector<1x8x64xf32>
    %76 = vector.shape_cast %75 : vector<1x8x64xf32> to vector<8x64xf32>
    %77 = vector.shape_cast %74 : vector<8x64xf32> to vector<1x8x64xf32>
    tpu.vector_store %arg6[%c0_98, %c0_99, %c0_100], %77 {strides = array<i32>} : memref<1x8x64xf32, #tpu.memory_space<vmem>>, vector<1x8x64xf32>,
    return
  }
  func.func @transform_0(%arg0: i32) -> (i32, i32, i32, i32) {
    %c0_i32 = arith.constant 0 : i32
    %c0_i32_0 = arith.constant 0 : i32
    %c0_i32_1 = arith.constant 0 : i32
    %c0_i32_2 = arith.constant 0 : i32
    return %arg0, %c0_i32, %c0_i32_0, %c0_i32_1 : i32, i32, i32, i32
  }
  func.func @transform_1(%arg0: i32) -> (i32, i32) {
    %c0_i32 = arith.constant 0 : i32
    %c0_i32_0 = arith.constant 0 : i32
    %c0_i32_1 = arith.constant 0 : i32
    return %c0_i32, %c0_i32_0 : i32, i32
  }
  func.func @transform_2(%arg0: i32) -> (i32, i32) {
    %c0_i32 = arith.constant 0 : i32
    %c0_i32_0 = arith.constant 0 : i32
    %c0_i32_1 = arith.constant 0 : i32
    return %c0_i32, %c0_i32_0 : i32, i32
  }
  func.func @transform_3(%arg0: i32) -> (i32, i32) {
    %c0_i32 = arith.constant 0 : i32
    %c0_i32_0 = arith.constant 0 : i32
    %c0_i32_1 = arith.constant 0 : i32
    return %c0_i32, %c0_i32_0 : i32, i32
  }
  func.func @transform_4(%arg0: i32) -> (i32, i32) {
    %c0_i32 = arith.constant 0 : i32
    %c0_i32_0 = arith.constant 0 : i32
    %c0_i32_1 = arith.constant 0 : i32
    return %c0_i32, %c0_i32_0 : i32, i32
  }
  func.func @transform_5(%arg0: i32) -> (i32, i32, i32) {
    %c0_i32 = arith.constant 0 : i32
    %c0_i32_0 = arith.constant 0 : i32
    %c0_i32_1 = arith.constant 0 : i32
    return %arg0, %c0_i32, %c0_i32_0 : i32, i32, i32
  }
}

</mosaic_0001>

<bundles_post_ra>
// kernel: tpu_custom_call.1
= control target key start
LH: loop header
LB: loop body
LE: loop exit
PB: predicated region body
PF: predicated region fallthrough
CT: control target
= control target key end

     0   :  { %10 = vsyncpa [#allocation5], 0  ;;  %s3730_s0 = inlined_call_operand.vmem [shape: f32[2,16,16,4], index: 0, kind: input, shape index: {}]   ;;  %s3731_s1 = inlined_call_operand.vmem [shape: f32[36,4], index: 1, kind: input, shape index: {}]   ;;  %s3732_s2 = inlined_call_operand.vmem [shape: f32[1,4], index: 2, kind: input, shape index: {}]   ;;  %s3733_s3 = inlined_call_operand.vmem [shape: f32[36,8], index: 3, kind: input, shape index: {}]   ;;  %s3734_s4 = inlined_call_operand.vmem [shape: f32[1,8], index: 4, kind: input, shape index: {}]   ;;  %s3735_s5 = inlined_call_operand.hbm [shape: f32[2,8,64], index: 5, kind: output, shape index: {}]  }
   0x1   :  { %12 = vsyncpa [#allocation5 + $0x1], 0  ;;  %s2793_s18 = smov 0   ;;  %s2795_s19 = smov 0  }
   0x2   :  { %s2797_s20 = smov 0   ;;  %s2799_s21 = smov 0  }
   0x3 LB: > { %s2814_s22 = sadd.s32 4294967295, %s2750_s21   ;;  %s2521_s23 = sadd.s32 4294967294, %s2750_s21   ;;  %s2750_s21 = sphi %s2799_s21, %s3741_s21   ;;  %s2746_s20 = sphi %s2797_s20, %s3740_s20   ;;  %s2742_s19 = sphi %s2795_s19, %s3739_s19   ;;  %s2738_s18 = sphi %s2793_s18, %s3738_s18  }
   0x4   : > { %s2818_s24 = sadd.s32 1, %s2750_s21   ;;  %s135_s25 = sadd.s32 1, %s2746_s20 }
   0x5   : > { %s132_s26 = ssub.s32 %s2750_s21, %s2818_s24  ;;  %p145_p0 = scmp.ne.s32.totalorder %s2746_s20, %s2742_s19 }
   0x6   : > { %p133_p1 = scmp.eq.s32.totalorder %s132_s26, 0  ;;  %p146_p2 = scmp.eq.s32.totalorder %s2814_s22, 1 }
   0x7   : > { %p151_p3 = scmp.ne.s32.totalorder %s2742_s19, %s2738_s18  ;;  %p152_p4 = scmp.eq.s32.totalorder %s2521_s23, 1 }
   0x8   : > { %s2829_s27 = scalar_select %p133_p1, %s2746_s20, %s135_s25  }
   0x9   : > { %p2831_p5 = por %p146_p2, %p145_p0  ;;  %p2835_p6 = por %p152_p4, %p151_p3 }
   0xa   : > { %p2524_p7 = scmp.ge.s32.totalorder %s2750_s21, 1  ;;  %p190_p8 = scmp.lt.s32.totalorder %s2750_s21, 3 }
   0xc   : > { %p191_p9 = pnand %p2524_p7, %p190_p8 }
   0xd   : > { %vm223_vm0 = vcmask (!%p191_p9), 31744   ;;  %vm225_vm1 = vcmask (!%p191_p9), 27648   ;;  %vm235_vm2 = vcmask (!%p191_p9), 25600   ;;  %v2752_v0 = vmov (!%p191_p9), 0.0   ;;  %p218_p10 = scmp.lt.s32.totalorder (!%p191_p9), %s2814_s22, 1  ;;  %s2754_s10 = smov (!%p191_p9), 8  }
   0xe   : > { %194 = sbr.rel (%p191_p9) target bundleno = 1071 (0x42f), region = 40  ;;  %224 = vst.msk [vmem:[#allocation2] sm:$0xff] (!%p191_p9), %vm223_vm0, %v2752_v0  ;;  %227 = vst.msk [vmem:[#allocation2 + $0x10] sm:$0xff] (!%p191_p9), %vm223_vm0, %v2752_v0  ;;  %v384_v1 = vlaneseq (!%p191_p9)  ;;  %v2753_v2 = vmov (!%p191_p9), 1983009808   ;;  %s2755_s11 = smov (!%p191_p9), 4  }
   0xf   : > { %226 = vst.msk [vmem:[#allocation2 + $0x8] sm:$0xf] (!%p191_p9), %vm225_vm1, %v2752_v0  ;;  %228 = vst.msk [vmem:[#allocation2 + $0x18] sm:$0xf] (!%p191_p9), %vm225_vm1, %v2752_v0  ;;  %v382_v3 = vunpack.c.l.s4 (!%p191_p9), %v2753_v2  ;;  %vm1228_vm3 = vcmask (!%p191_p9), 1041409   ;;  %vm1230_vm4 = vcmask (!%p191_p9), 1042434  }
  0x10   : > { %230 = vst.msk [vmem:[#allocation2 + $0xa0] sm:$0xff] (!%p191_p9), %vm223_vm0, %v2752_v0  ;;  %232 = vst.msk [vmem:[#allocation2 + $0xb0] sm:$0xff] (!%p191_p9), %vm223_vm0, %v2752_v0  ;;  %v385_v4 = vshrl.u32 (!%p191_p9), %v384_v1, 7  ;;  %vm1232_vm5 = vcmask (!%p191_p9), 1043459   ;;  %vm1234_vm6 = vcmask (!%p191_p9), 1044484   ;;  %vm1236_vm7 = vcmask (!%p191_p9), 1045509  }
  0x11   : > { %231 = vst.msk [vmem:[#allocation2 + $0xa8] sm:$0xf] (!%p191_p9), %vm225_vm1, %v2752_v0  ;;  %233 = vst.msk [vmem:[#allocation2 + $0xb8] sm:$0xf] (!%p191_p9), %vm225_vm1, %v2752_v0  ;;  %v383_v5 = vunpack.c.0.s8 (!%p191_p9), %v382_v3  ;;  %vm1238_vm8 = vcmask (!%p191_p9), 1046534   ;;  %vm1240_vm9 = vcmask (!%p191_p9), 1047559  }
  0x12   : > { %252 = vst.msk [vmem:[#allocation3] sm:$0xff] (!%p191_p9), %vm223_vm0, %v2752_v0  ;;  %255 = vst.msk [vmem:[#allocation3 + $0x10] sm:$0xff] (!%p191_p9), %vm223_vm0, %v2752_v0  ;;  %s2756_s12 = smov (!%p191_p9), 12   ;;  %s2757_s13 = smov (!%p191_p9), 16   ;;  %vm1744_vm10 = vcmask (!%p191_p9), 1043456   ;;  %vm253_vm11 = vcmask (!%p191_p9), 29696  }
  0x13   : > { %257 = vst.msk [vmem:[#allocation3 + $0x20] sm:$0xff] (!%p191_p9), %vm223_vm0, %v2752_v0  ;;  %260 = vst.msk [vmem:[#allocation3 + $0xb0] sm:$0xff] (!%p191_p9), %vm223_vm0, %v2752_v0  ;;  %v2909_v9 = vsub.s32 (!%p191_p9), %v383_v5, %v385_v4  ;;  %s2758_s14 = smov (!%p191_p9), 20   ;;  %s2759_s15 = smov (!%p191_p9), 24   ;;  %vm1644_vm12 = vcmask (!%p191_p9), 64512   ;;  %vm1653_vm13 = vcmask (!%p191_p9), 97280  }
  0x14   : > { %262 = vst.msk [vmem:[#allocation3 + $0xc0] sm:$0xff] (!%p191_p9), %vm223_vm0, %v2752_v0  ;;  %264 = vst.msk [vmem:[#allocation3 + $0xd0] sm:$0xff] (!%p191_p9), %vm223_vm0, %v2752_v0  ;;  %s2760_s16 = smov (!%p191_p9), 28   ;;  %s2761_s17 = smov (!%p191_p9), 32   ;;  %vm1662_vm14 = vcmask (!%p191_p9), 130048   ;;  %vm1671_vm15 = vcmask (!%p191_p9), 162816  }
  0x15   : > { %237 = vst.msk [vmem:[#allocation2 + $0x30] sm:$0x3] %vm235_vm2, %v2752_v0  ;;  %236 = vst.msk [vmem:[#allocation2 + $0x20] sm:$0x3] %vm235_vm2, %v2752_v0  ;;  %s219_s30 = scalar_select %p218_p10, %s2814_s22, 1  ;;  %vm1680_vm1 = vcmask 195584  }
  0x16   : > { %238 = vst.msk [vmem:[#allocation2 + $0x40] sm:$0x3] %vm235_vm2, %v2752_v0  ;;  %239 = vst.msk [vmem:[#allocation2 + $0x50] sm:$0x3] %vm235_vm2, %v2752_v0  ;;  %v1323_v10 = vld [vmem:[#allocation2 + $0x4] sm:$0xff]  ;;  %v1324_v12 = vld [vmem:[#allocation2 + $0x14] sm:$0xff] }
  0x17   : > { %240 = vst.msk [vmem:[#allocation2 + $0x60] sm:$0x3] %vm235_vm2, %v2752_v0  ;;  %241 = vst.msk [vmem:[#allocation2 + $0x70] sm:$0x3] %vm235_vm2, %v2752_v0  ;;  %s2552_s6 = sshll.u32 %s219_s30, 8  ;;  %v1315_v11 = vld [vmem:[#allocation2 + $0x2] sm:$0xff]  ;;  %1420 = vrot.lane.b32.xlu1 %v1323_v10, %s2754_s10 }
  0x18   : > { %242 = vst.msk [vmem:[#allocation2 + $0x80] sm:$0x3] %vm235_vm2, %v2752_v0  ;;  %243 = vst.msk [vmem:[#allocation2 + $0x90] sm:$0x3] %vm235_vm2, %v2752_v0  ;;  %s2904_s9 = scalar_lea.vmem %s3730_s0, %s2552_s6  ;;  %1388 = vrot.lane.b32.xlu0 %v1315_v11, %s2755_s11  ;;  %v1316_v16 = vld [vmem:[#allocation2 + $0x12] sm:$0xff] }
  0x19   : > { %244 = vst.msk [vmem:[#allocation2 + $0x2a] sm:$0x3] %vm235_vm2, %v2752_v0  ;;  %245 = vst.msk [vmem:[#allocation2 + $0x3a] sm:$0x3] %vm235_vm2, %v2752_v0  ;;  %v288_v6 = vld [vmem:[%s2904_s9 + $0x20] sm:$0xff]  ;;  %v289_v7 = vld [vmem:[%s2904_s9 + $0x28] sm:$0xff] }
  0x1a   : > { %246 = vst.msk [vmem:[#allocation2 + $0x4a] sm:$0x3] %vm235_vm2, %v2752_v0  ;;  %247 = vst.msk [vmem:[#allocation2 + $0x5a] sm:$0x3] %vm235_vm2, %v2752_v0  ;;  %v290_v8 = vld [vmem:[%s2904_s9 + $0x30] sm:$0xff]  ;;  %v322_v13 = vsel %vm223_vm0, %v288_v6, -inf }
  0x1b   : > { %248 = vst.msk [vmem:[#allocation2 + $0x6a] sm:$0x3] %vm235_vm2, %v2752_v0  ;;  %249 = vst.msk [vmem:[#allocation2 + $0x7a] sm:$0x3] %vm235_vm2, %v2752_v0  ;;  %v323_v14 = vsel %vm223_vm0, %v290_v8, -inf  ;;  %v325_v15 = vsel %vm223_vm0, %v289_v7, -inf  ;;  %1422 = vrot.lane.b32.xlu1 %v1324_v12, %s2754_s10 }
  0x1c   : > { %250 = vst.msk [vmem:[#allocation2 + $0x8a] sm:$0x3] %vm235_vm2, %v2752_v0  ;;  %251 = vst.msk [vmem:[#allocation2 + $0x9a] sm:$0x3] %vm235_vm2, %v2752_v0  ;;  %v291_v17 = vld [vmem:[%s2904_s9 + $0x38] sm:$0xff]  ;;  %v324_v18 = vmax.f32 %v322_v13, %v323_v14  ;;  %v284_v19 = vld [vmem:[%s2904_s9] sm:$0xff]  ;;  %1390 = vrot.lane.b32.xlu0 %v1316_v16, %s2755_s11 }
  0x1d   : > { %v326_v20 = vsel %vm223_vm0, %v291_v17, -inf  ;;  %v285_v21 = vld [vmem:[%s2904_s9 + $0x8] sm:$0xff]  ;;  %v286_v22 = vld [vmem:[%s2904_s9 + $0x10] sm:$0xff]  ;;  %v287_v23 = vld [vmem:[%s2904_s9 + $0x18] sm:$0xff]  ;;  %v316_v24 = vsel %vm223_vm0, %v284_v19, -inf }
  0x1e   : > { %v327_v25 = vmax.f32 %v325_v15, %v326_v20  ;;  %v414_v26 = vcombine.high %v324_v18, %v324_v18  ;;  %v421_v27 = vrot.slane %v324_v18, %v2909_v9  ;;  %v317_v28 = vsel %vm223_vm0, %v286_v22, -inf  ;;  %v292_v29 = vld [vmem:[%s2904_s9 + $0x40] sm:$0xff]  ;;  %254 = vst.msk [vmem:[#allocation3 + $0x8] sm:$0x3f] %vm253_vm11, %v2752_v0  ;;  %256 = vst.msk [vmem:[#allocation3 + $0x18] sm:$0x3f] %vm253_vm11, %v2752_v0 }
  0x1f   : > { %v2926_v30 = vmax.f32 %v316_v24, %v317_v28  ;;  %v319_v31 = vsel %vm223_vm0, %v285_v21, -inf  ;;  %v320_v32 = vsel %vm223_vm0, %v287_v23, -inf  ;;  %v2931_v33 = vsel %vm223_vm0, %v292_v29, -inf  ;;  %258 = vst.msk [vmem:[#allocation3 + $0x28] sm:$0x3f] %vm253_vm11, %v2752_v0 }
  0x20   : > { %v428_v34 = vrot.slane %v414_v26, %v2909_v9  ;;  %v429_v35 = vcombine.high %v421_v27, %v421_v27  ;;  %v431_v36 = vcombine.high %v327_v25, %v327_v25  ;;  %v772_v37 = vsel %vm235_vm2, %v421_v27, -inf  ;;  %261 = vst.msk [vmem:[#allocation3 + $0xb8] sm:$0x3f] %vm253_vm11, %v2752_v0  ;;  %263 = vst.msk [vmem:[#allocation3 + $0xc8] sm:$0x3f] %vm253_vm11, %v2752_v0 }
  0x21   : > { %v438_v38 = vrot.slane %v327_v25, %v2909_v9  ;;  %v773_v39 = vrot.slane %v772_v37, 4  ;;  %v2938_v40 = vmax.f32 %v319_v31, %v320_v32  ;;  %v380_v41 = vcombine.high %v2926_v30, %v2926_v30  ;;  %265 = vst.msk [vmem:[#allocation3 + $0xd8] sm:$0x3f] %vm253_vm11, %v2752_v0 }
  0x22   : > { %v430_v42 = vcombine.high %v428_v34, %v428_v34  ;;  %v445_v43 = vrot.slane %v431_v36, %v2909_v9  ;;  %v779_v44 = vsel %vm235_vm2, %v429_v35, -inf  ;;  %v786_v45 = vsel %vm235_vm2, %v428_v34, -inf }
  0x23   : > { %v446_v46 = vcombine.high %v438_v38, %v438_v38  ;;  %v774_v47 = vmax.f32 %v772_v37, %v773_v39  ;;  %v780_v48 = vrot.slane %v779_v44, 4  ;;  %v787_v49 = vrot.slane %v786_v45, 4 }
  0x24   : > { %v447_v50 = vcombine.high %v445_v43, %v445_v43  ;;  %v793_v51 = vsel %vm235_vm2, %v430_v42, -inf  ;;  %v800_v52 = vsel %vm235_vm2, %v438_v38, -inf  ;;  %v814_v53 = vsel %vm235_vm2, %v445_v43, -inf }
  0x25   : > { %v775_v54 = vrot.slane %v774_v47, 2  ;;  %v781_v55 = vmax.f32 %v779_v44, %v780_v48  ;;  %v788_v56 = vmax.f32 %v786_v45, %v787_v49  ;;  %v794_v57 = vrot.slane %v793_v51, 4 }
  0x26   : > { %v801_v58 = vrot.slane %v800_v52, 4  ;;  %v807_v59 = vsel %vm235_vm2, %v446_v46, -inf  ;;  %v815_v60 = vrot.slane %v814_v53, 4  ;;  %v821_v61 = vsel %vm235_vm2, %v447_v50, -inf }
  0x27   : > { %v776_v62 = vmax.f32 %v774_v47, %v775_v54  ;;  %v782_v63 = vrot.slane %v781_v55, 2  ;;  %v789_v1 = vrot.slane %v788_v56, 2  ;;  %v795_v2 = vmax.f32 %v793_v51, %v794_v57 }
  0x28   : > { %v802_v3 = vmax.f32 %v800_v52, %v801_v58  ;;  %v808_v4 = vrot.slane %v807_v59, 4  ;;  %v816_v5 = vmax.f32 %v814_v53, %v815_v60  ;;  %v822_v6 = vrot.slane %v821_v61, 4 }
  0x29   : > { %v777_v7 = vrot.slane %v776_v62, 1  ;;  %v783_v8 = vmax.f32 %v781_v55, %v782_v63  ;;  %v790_v10 = vmax.f32 %v788_v56, %v789_v1  ;;  %v796_v11 = vrot.slane %v795_v2, 2 }
  0x2a   : > { %v803_v12 = vrot.slane %v802_v3, 2  ;;  %v809_v13 = vmax.f32 %v807_v59, %v808_v4  ;;  %v817_v14 = vrot.slane %v816_v5, 2  ;;  %v823_v15 = vmax.f32 %v821_v61, %v822_v6 }
  0x2b   : > { %v778_v16 = vmax.f32 %v776_v62, %v777_v7  ;;  %v784_v17 = vrot.slane %v783_v8, 1  ;;  %v791_v18 = vrot.slane %v790_v10, 1  ;;  %v797_v19 = vmax.f32 %v795_v2, %v796_v11 }
  0x2c   : > { %v804_v20 = vmax.f32 %v802_v3, %v803_v12  ;;  %v810_v21 = vrot.slane %v809_v13, 2  ;;  %v818_v22 = vmax.f32 %v816_v5, %v817_v14  ;;  %v824_v23 = vrot.slane %v823_v15, 2 }
  0x2d   : > { %v785_v24 = vmax.f32 %v783_v8, %v784_v17  ;;  %v792_v25 = vmax.f32 %v790_v10, %v791_v18  ;;  %v798_v26 = vrot.slane %v797_v19, 1  ;;  %v387_v27 = vrot.slane %v2926_v30, %v2909_v9 }
  0x2e   : > { %v805_v28 = vrot.slane %v804_v20, 1  ;;  %v811_v29 = vmax.f32 %v809_v13, %v810_v21  ;;  %v819_v31 = vrot.slane %v818_v22, 1  ;;  %v825_v32 = vmax.f32 %v823_v15, %v824_v23 }
  0x2f   : > { %v799_v34 = vmax.f32 %v797_v19, %v798_v26  ;;  %v1242_v35 = vsel %vm1228_vm3, %v785_v24, %v778_v16  ;;  %v394_v36 = vrot.slane %v380_v41, %v2909_v9  ;;  %v395_v37 = vcombine.high %v387_v27, %v387_v27 }
  0x30   : > { %v806_v38 = vmax.f32 %v804_v20, %v805_v28  ;;  %v812_v39 = vrot.slane %v811_v29, 1  ;;  %v820_v42 = vmax.f32 %v818_v22, %v819_v31  ;;  %v826_v43 = vrot.slane %v825_v32, 1 }
  0x31   : > { %v1243_v44 = vsel %vm1230_vm4, %v792_v25, %v1242_v35  ;;  %v396_v45 = vcombine.high %v394_v36, %v394_v36  ;;  %v397_v46 = vcombine.high %v2938_v40, %v2938_v40  ;;  %v404_v47 = vrot.slane %v2938_v40, %v2909_v9 }
  0x32   : > { %v813_v48 = vmax.f32 %v811_v29, %v812_v39  ;;  %v827_v49 = vmax.f32 %v825_v32, %v826_v43  ;;  %v1244_v50 = vsel %vm1232_vm5, %v799_v34, %v1243_v44  ;;  %v716_v30 = vsel %vm235_vm2, %v387_v27, -inf  ;;  %v294_v27 = vld [vmem:[%s2904_s9 + $0x50] sm:$0xff]  ;;  %v293_v44 = vld [vmem:[%s2904_s9 + $0x48] sm:$0xff] }
  0x33   : > { %v1245_v41 = vsel %vm1234_vm6, %v806_v38, %v1244_v50  ;;  %v411_v51 = vrot.slane %v397_v46, %v2909_v9  ;;  %v412_v52 = vcombine.high %v404_v47, %v404_v47  ;;  %v717_v53 = vrot.slane %v716_v30, 4  ;;  %v295_v50 = vld [vmem:[%s2904_s9 + $0x58] sm:$0xff] }
  0x34   : > { %v1246_v54 = vsel %vm1236_vm7, %v813_v48, %v1245_v41  ;;  %v723_v55 = vsel %vm235_vm2, %v395_v37, -inf  ;;  %v730_v56 = vsel %vm235_vm2, %v394_v36, -inf  ;;  %v737_v40 = vsel %vm235_vm2, %v396_v45, -inf }
  0x35   : > { %v1247_v57 = vsel %vm1238_vm8, %v820_v42, %v1246_v54  ;;  %v413_v58 = vcombine.high %v411_v51, %v411_v51  ;;  %v718_v59 = vmax.f32 %v716_v30, %v717_v53  ;;  %v724_v60 = vrot.slane %v723_v55, 4 }
  0x36   : > { %v1248_v61 = vsel %vm1240_vm9, %v827_v49, %v1247_v57  ;;  %v731_v62 = vrot.slane %v730_v56, 4  ;;  %v738_v63 = vrot.slane %v737_v40, 4  ;;  %v744_v1 = vsel %vm235_vm2, %v404_v47, -inf  ;;  %v298_v57 = vld [vmem:[%s2904_s9 + $0x70] sm:$0xff] }
  0x37   : > { %1300 = vst.msk [vmem:[#allocation2 + $0x32] sm:$0xff] %vm223_vm0, %v1248_v61  ;;  %v719_v2 = vrot.slane %v718_v59, 2  ;;  %v725_v3 = vmax.f32 %v723_v55, %v724_v60  ;;  %v745_v4 = vrot.slane %v744_v1, 4  ;;  %v751_v5 = vsel %vm235_vm2, %v412_v52, -inf }
  0x38   : > { %v732_v6 = vmax.f32 %v730_v56, %v731_v62  ;;  %v739_v7 = vmax.f32 %v737_v40, %v738_v63  ;;  %v752_v8 = vrot.slane %v751_v5, 4  ;;  %v758_v10 = vsel %vm235_vm2, %v411_v51, -inf  ;;  %v296_v40 = vld [vmem:[%s2904_s9 + $0x60] sm:$0xff] }
  0x39   : > { %v720_v11 = vmax.f32 %v718_v59, %v719_v2  ;;  %v726_v12 = vrot.slane %v725_v3, 2  ;;  %v746_v13 = vmax.f32 %v744_v1, %v745_v4  ;;  %v759_v14 = vrot.slane %v758_v10, 4 }
  0x3a   : > { %v733_v15 = vrot.slane %v732_v6, 2  ;;  %v740_v16 = vrot.slane %v739_v7, 2  ;;  %v753_v17 = vmax.f32 %v751_v5, %v752_v8  ;;  %v765_v18 = vsel %vm235_vm2, %v413_v58, -inf }
  0x3b   : > { %v721_v19 = vrot.slane %v720_v11, 1  ;;  %v727_v20 = vmax.f32 %v725_v3, %v726_v12  ;;  %v747_v21 = vrot.slane %v746_v13, 2  ;;  %v760_v22 = vmax.f32 %v758_v10, %v759_v14 }
  0x3c   : > { %v734_v23 = vmax.f32 %v732_v6, %v733_v15  ;;  %v741_v24 = vmax.f32 %v739_v7, %v740_v16  ;;  %v754_v25 = vrot.slane %v753_v17, 2  ;;  %v766_v26 = vrot.slane %v765_v18, 4 }
  0x3d   : > { %v722_v28 = vmax.f32 %v720_v11, %v721_v19  ;;  %v728_v29 = vrot.slane %v727_v20, 1  ;;  %v748_v31 = vmax.f32 %v746_v13, %v747_v21  ;;  %v761_v32 = vrot.slane %v760_v22, 2 }
  0x3e   : > { %v1332_v34 = vld [vmem:[#allocation2 + $0x30] sm:$0xff]  ;;  %v735_v35 = vrot.slane %v734_v23, 1  ;;  %v742_v36 = vrot.slane %v741_v24, 1  ;;  %v755_v37 = vmax.f32 %v753_v17, %v754_v25  ;;  %v767_v38 = vmax.f32 %v765_v18, %v766_v26 }
  0x3f   : > { %1454 = vrot.lane.b32.xlu1 %v1332_v34, %s2756_s12  ;;  %v729_v39 = vmax.f32 %v727_v20, %v728_v29  ;;  %v749_v42 = vrot.slane %v748_v31, 1  ;;  %v762_v43 = vmax.f32 %v760_v22, %v761_v32  ;;  %v329_v45 = vsel %vm223_vm0, %v294_v27, -inf }
  0x40   : > { %v736_v46 = vmax.f32 %v734_v23, %v735_v35  ;;  %v743_v47 = vmax.f32 %v741_v24, %v742_v36  ;;  %v756_v48 = vrot.slane %v755_v37, 1  ;;  %v768_v49 = vrot.slane %v767_v38, 2 }
  0x41   : > { %v750_v30 = vmax.f32 %v748_v31, %v749_v42  ;;  %v763_v41 = vrot.slane %v762_v43, 1  ;;  %v1229_v51 = vsel %vm1228_vm3, %v729_v39, %v722_v28  ;;  %v330_v52 = vmax.f32 %v2931_v33, %v329_v45 }
  0x42   : > { %v757_v53 = vmax.f32 %v755_v37, %v756_v48  ;;  %v769_v54 = vmax.f32 %v767_v38, %v768_v49  ;;  %v1231_v55 = vsel %vm1230_vm4, %v736_v46, %v1229_v51  ;;  %v331_v56 = vsel %vm223_vm0, %v293_v44, -inf }
  0x43   : > { %v764_v58 = vmax.f32 %v762_v43, %v763_v41  ;;  %v1233_v59 = vsel %vm1232_vm5, %v743_v47, %v1231_v55  ;;  %v332_v60 = vsel %vm223_vm0, %v295_v50, -inf  ;;  %v448_v61 = vcombine.high %v330_v52, %v330_v52 }
  0x44   : > { %v770_v62 = vrot.slane %v769_v54, 1  ;;  %v1235_v63 = vsel %vm1234_vm6, %v750_v30, %v1233_v59  ;;  %v333_v1 = vmax.f32 %v331_v56, %v332_v60  ;;  %v455_v33 = vrot.slane %v330_v52, %v2909_v9 }
  0x45   : > { %v1237_v2 = vsel %vm1236_vm7, %v757_v53, %v1235_v63  ;;  %v462_v3 = vrot.slane %v448_v61, %v2909_v9  ;;  %v2995_v4 = vsel %vm223_vm0, %v296_v40, -inf  ;;  %v2998_v5 = vsel %vm223_vm0, %v298_v57, -inf  ;;  %v297_v63 = vld [vmem:[%s2904_s9 + $0x68] sm:$0xff] }
  0x46   : > { %v771_v6 = vmax.f32 %v769_v54, %v770_v62  ;;  %v1239_v7 = vsel %vm1238_vm8, %v764_v58, %v1237_v2  ;;  %v463_v8 = vcombine.high %v455_v33, %v455_v33  ;;  %v465_v10 = vcombine.high %v333_v1, %v333_v1 }
  0x47   : > { %v464_v11 = vcombine.high %v462_v3, %v462_v3  ;;  %v472_v12 = vrot.slane %v333_v1, %v2909_v9  ;;  %v828_v13 = vsel %vm235_vm2, %v455_v33, -inf  ;;  %v842_v14 = vsel %vm235_vm2, %v462_v3, -inf }
  0x48   : > { %v1241_v15 = vsel %vm1240_vm9, %v771_v6, %v1239_v7  ;;  %v479_v16 = vrot.slane %v465_v10, %v2909_v9  ;;  %v829_v17 = vrot.slane %v828_v13, 4  ;;  %v835_v18 = vsel %vm235_vm2, %v463_v8, -inf  ;;  %v299_v6 = vld [vmem:[%s2904_s9 + $0x78] sm:$0xff] }
  0x49   : > { %1299 = vst.msk [vmem:[#allocation2 + $0x22] sm:$0xff] %vm223_vm0, %v1241_v15  ;;  %v480_v19 = vcombine.high %v472_v12, %v472_v12  ;;  %v836_v20 = vrot.slane %v835_v18, 4  ;;  %v843_v21 = vrot.slane %v842_v14, 4  ;;  %v849_v22 = vsel %vm235_vm2, %v464_v11, -inf }
  0x4a   : > { %v481_v23 = vcombine.high %v479_v16, %v479_v16  ;;  %v830_v24 = vmax.f32 %v828_v13, %v829_v17  ;;  %v850_v25 = vrot.slane %v849_v22, 4  ;;  %v856_v26 = vsel %vm235_vm2, %v472_v12, -inf  ;;  %v1340_v17 = vld [vmem:[#allocation2 + $0x32] sm:$0xff] }
  0x4b   : > { %v837_v27 = vmax.f32 %v835_v18, %v836_v20  ;;  %v844_v28 = vmax.f32 %v842_v14, %v843_v21  ;;  %v857_v29 = vrot.slane %v856_v26, 4  ;;  %v863_v31 = vsel %vm235_vm2, %v480_v19, -inf }
  0x4c   : > { %v831_v32 = vrot.slane %v830_v24, 2  ;;  %v851_v34 = vmax.f32 %v849_v22, %v850_v25  ;;  %v864_v35 = vrot.slane %v863_v31, 4  ;;  %v870_v36 = vsel %vm235_vm2, %v479_v16, -inf  ;;  %v300_v16 = vld [vmem:[%s2904_s9 + $0x80] sm:$0xff] }
  0x4d   : > { %v838_v37 = vrot.slane %v837_v27, 2  ;;  %v845_v38 = vrot.slane %v844_v28, 2  ;;  %v858_v39 = vmax.f32 %v856_v26, %v857_v29  ;;  %v871_v42 = vrot.slane %v870_v36, 4 }
  0x4e   : > { %v832_v43 = vmax.f32 %v830_v24, %v831_v32  ;;  %v852_v44 = vrot.slane %v851_v34, 2  ;;  %v865_v45 = vmax.f32 %v863_v31, %v864_v35  ;;  %v877_v46 = vsel %vm235_vm2, %v481_v23, -inf }
  0x4f   : > { %v839_v47 = vmax.f32 %v837_v27, %v838_v37  ;;  %v846_v48 = vmax.f32 %v844_v28, %v845_v38  ;;  %v859_v49 = vrot.slane %v858_v39, 2  ;;  %v872_v50 = vmax.f32 %v870_v36, %v871_v42 }
  0x50   : > { %v1331_v30 = vld [vmem:[#allocation2 + $0x20] sm:$0xff]  ;;  %v833_v51 = vrot.slane %v832_v43, 1  ;;  %v853_v52 = vmax.f32 %v851_v34, %v852_v44  ;;  %v866_v53 = vrot.slane %v865_v45, 2  ;;  %v878_v54 = vrot.slane %v877_v46, 4 }
  0x51   : > { %v1339_v41 = vld [vmem:[#allocation2 + $0x22] sm:$0xff]  ;;  %1452 = vrot.lane.b32.xlu0 %v1331_v30, %s2756_s12  ;;  %v840_v55 = vrot.slane %v839_v47, 1  ;;  %v847_v56 = vrot.slane %v846_v48, 1  ;;  %v860_v40 = vmax.f32 %v858_v39, %v859_v49  ;;  %v873_v57 = vrot.slane %v872_v50, 2 }
  0x52   : > { %1392 = vrot.lane.b32.xlu1 %v1339_v41, %s2755_s11  ;;  %v1347_v58 = vld [vmem:[#allocation2 + $0x24] sm:$0xff]  ;;  %v834_v59 = vmax.f32 %v832_v43, %v833_v51  ;;  %v854_v60 = vrot.slane %v853_v52, 1  ;;  %v867_v61 = vmax.f32 %v865_v45, %v866_v53  ;;  %v879_v62 = vmax.f32 %v877_v46, %v878_v54  ;;  %v1348_v51 = vld [vmem:[#allocation2 + $0x34] sm:$0xff] }
  0x53   : > { %v841_v1 = vmax.f32 %v839_v47, %v840_v55  ;;  %v848_v33 = vmax.f32 %v846_v48, %v847_v56  ;;  %v861_v2 = vrot.slane %v860_v40, 1  ;;  %v874_v3 = vmax.f32 %v872_v50, %v873_v57 }
  0x54   : > { %v855_v7 = vmax.f32 %v853_v52, %v854_v60  ;;  %v868_v8 = vrot.slane %v867_v61, 1  ;;  %v880_v10 = vrot.slane %v879_v62, 2  ;;  %v336_v11 = vmax.f32 %v2995_v4, %v2998_v5  ;;  %v302_v5 = vld [vmem:[%s2904_s9 + $0x90] sm:$0xff] }
  0x55   : > { %1484 = vrot.lane.b32.xlu0 %v1339_v41, %s2757_s13  ;;  %v862_v12 = vmax.f32 %v860_v40, %v861_v2  ;;  %v875_v13 = vrot.slane %v874_v3, 1  ;;  %v1249_v14 = vsel %vm1228_vm3, %v841_v1, %v834_v59  ;;  %v337_v15 = vsel %vm223_vm0, %v297_v63, -inf }
  0x56   : > { %1516 = vrot.lane.b32.xlu1 %v1347_v58, %s2758_s14  ;;  %v869_v18 = vmax.f32 %v867_v61, %v868_v8  ;;  %v881_v19 = vmax.f32 %v879_v62, %v880_v10  ;;  %v1250_v20 = vsel %vm1230_vm4, %v848_v33, %v1249_v14  ;;  %v338_v4 = vsel %vm223_vm0, %v299_v6, -inf }
  0x57   : > { %v876_v21 = vmax.f32 %v874_v3, %v875_v13  ;;  %v1251_v22 = vsel %vm1232_vm5, %v855_v7, %v1250_v20  ;;  %v339_v23 = vmax.f32 %v337_v15, %v338_v4  ;;  %v482_v24 = vcombine.high %v336_v11, %v336_v11 }
  0x58   : > { %v882_v25 = vrot.slane %v881_v19, 1  ;;  %v1252_v26 = vsel %vm1234_vm6, %v862_v12, %v1251_v22  ;;  %v489_v27 = vrot.slane %v336_v11, %v2909_v9  ;;  %v3031_v28 = vsel %vm223_vm0, %v300_v16, -inf }
  0x59   : > { %1486 = vrot.lane.b32.xlu0 %v1340_v17, %s2757_s13  ;;  %v1253_v29 = vsel %vm1236_vm7, %v869_v18, %v1252_v26  ;;  %v496_v31 = vrot.slane %v482_v24, %v2909_v9  ;;  %v499_v32 = vcombine.high %v339_v23, %v339_v23  ;;  %v3038_v34 = vsel %vm223_vm0, %v302_v5, -inf }
  0x5a   : > { %1424 = vrot.lane.b32.xlu1 %v1347_v58, %s2754_s10  ;;  %v883_v35 = vmax.f32 %v881_v19, %v882_v25  ;;  %v1254_v36 = vsel %vm1238_vm8, %v876_v21, %v1253_v29  ;;  %v497_v37 = vcombine.high %v489_v27, %v489_v27  ;;  %v506_v38 = vrot.slane %v339_v23, %v2909_v9  ;;  %v301_v25 = vld [vmem:[%s2904_s9 + $0x88] sm:$0xff] }
  0x5b   : > { %v498_v39 = vcombine.high %v496_v31, %v496_v31  ;;  %v513_v42 = vrot.slane %v499_v32, %v2909_v9  ;;  %v884_v43 = vsel %vm235_vm2, %v489_v27, -inf  ;;  %v898_v44 = vsel %vm235_vm2, %v496_v31, -inf  ;;  %v303_v32 = vld [vmem:[%s2904_s9 + $0x98] sm:$0xff] }
  0x5c   : > { %v1255_v45 = vsel %vm1240_vm9, %v883_v35, %v1254_v36  ;;  %v514_v46 = vcombine.high %v506_v38, %v506_v38  ;;  %v885_v47 = vrot.slane %v884_v43, 4  ;;  %v891_v48 = vsel %vm235_vm2, %v497_v37, -inf }
  0x5d   : > { %1394 = vrot.lane.b32.xlu0 %v1340_v17, %s2755_s11  ;;  %1301 = vst.msk [vmem:[#allocation2 + $0x42] sm:$0xff] %vm223_vm0, %v1255_v45  ;;  %v515_v49 = vcombine.high %v513_v42, %v513_v42  ;;  %v892_v50 = vrot.slane %v891_v48, 4  ;;  %v899_v30 = vrot.slane %v898_v44, 4  ;;  %v905_v41 = vsel %vm235_vm2, %v498_v39, -inf  ;;  %v304_v45 = vld [vmem:[%s2904_s9 + $0xa0] sm:$0xff] }
  0x5e   : > { %v886_v52 = vmax.f32 %v884_v43, %v885_v47  ;;  %v906_v53 = vrot.slane %v905_v41, 4  ;;  %v912_v54 = vsel %vm235_vm2, %v506_v38, -inf  ;;  %v919_v55 = vsel %vm235_vm2, %v514_v46, -inf }
  0x5f   : > { %v893_v56 = vmax.f32 %v891_v48, %v892_v50  ;;  %v900_v40 = vmax.f32 %v898_v44, %v899_v30  ;;  %v913_v57 = vrot.slane %v912_v54, 4  ;;  %v920_v58 = vrot.slane %v919_v55, 4 }
  0x60   : > { %v887_v59 = vrot.slane %v886_v52, 2  ;;  %v907_v60 = vmax.f32 %v905_v41, %v906_v53  ;;  %v926_v61 = vsel %vm235_vm2, %v513_v42, -inf  ;;  %v933_v62 = vsel %vm235_vm2, %v515_v49, -inf }
  0x61   : > { %1518 = vrot.lane.b32.xlu0 %v1348_v51, %s2758_s14  ;;  %v894_v63 = vrot.slane %v893_v56, 2  ;;  %v901_v1 = vrot.slane %v900_v40, 2  ;;  %v914_v33 = vmax.f32 %v912_v54, %v913_v57  ;;  %v921_v2 = vmax.f32 %v919_v55, %v920_v58 }
  0x62   : > { %v888_v3 = vmax.f32 %v886_v52, %v887_v59  ;;  %v908_v6 = vrot.slane %v907_v60, 2  ;;  %v927_v7 = vrot.slane %v926_v61, 4  ;;  %v934_v8 = vrot.slane %v933_v62, 4 }
  0x63   : > { %v895_v10 = vmax.f32 %v893_v56, %v894_v63  ;;  %v902_v11 = vmax.f32 %v900_v40, %v901_v1  ;;  %v915_v12 = vrot.slane %v914_v33, 2  ;;  %v922_v13 = vrot.slane %v921_v2, 2 }
  0x64   : > { %v1356_v14 = vld [vmem:[#allocation2 + $0x40] sm:$0xff]  ;;  %v889_v15 = vrot.slane %v888_v3, 1  ;;  %v909_v16 = vmax.f32 %v907_v60, %v908_v6  ;;  %v928_v17 = vmax.f32 %v926_v61, %v927_v7  ;;  %v935_v18 = vmax.f32 %v933_v62, %v934_v8 }
  0x65   : > { %1548 = vrot.lane.b32.xlu1 %v1356_v14, %s2759_s15  ;;  %1426 = vrot.lane.b32.xlu0 %v1348_v51, %s2754_s10  ;;  %v896_v19 = vrot.slane %v895_v10, 1  ;;  %v903_v20 = vrot.slane %v902_v11, 1  ;;  %v916_v4 = vmax.f32 %v914_v33, %v915_v12  ;;  %v923_v5 = vmax.f32 %v921_v2, %v922_v13  ;;  %v3066_v49 = vld [vmem:[#allocation2 + $0x42] sm:$0xff]  ;;  %v306_v51 = vld [vmem:[%s2904_s9 + $0xb0] sm:$0xff] }
  0x66   : > { %v890_v21 = vmax.f32 %v888_v3, %v889_v15  ;;  %v910_v22 = vrot.slane %v909_v16, 1  ;;  %v929_v23 = vrot.slane %v928_v17, 2  ;;  %v936_v24 = vrot.slane %v935_v18, 2 }
  0x67   : > { %v897_v26 = vmax.f32 %v895_v10, %v896_v19  ;;  %v904_v27 = vmax.f32 %v902_v11, %v903_v20  ;;  %v917_v29 = vrot.slane %v916_v4, 1  ;;  %v924_v31 = vrot.slane %v923_v5, 1 }
  0x68   : > { %v911_v35 = vmax.f32 %v909_v16, %v910_v22  ;;  %v930_v36 = vmax.f32 %v928_v17, %v929_v23  ;;  %v937_v37 = vmax.f32 %v935_v18, %v936_v24  ;;  %v342_v38 = vmax.f32 %v3031_v28, %v3038_v34 }
  0x69   : > { %1456 = vrot.lane.b32.xlu1 %v1356_v14, %s2756_s12  ;;  %v918_v39 = vmax.f32 %v916_v4, %v917_v29  ;;  %v925_v42 = vmax.f32 %v923_v5, %v924_v31  ;;  %v1256_v43 = vsel %vm1228_vm3, %v897_v26, %v890_v21  ;;  %v343_v44 = vsel %vm223_vm0, %v301_v25, -inf  ;;  %v3094_v14 = vld [vmem:[#allocation2 + $0x44] sm:$0xff] }
  0x6a   : > { %v931_v46 = vrot.slane %v930_v36, 1  ;;  %v938_v47 = vrot.slane %v937_v37, 1  ;;  %v1257_v48 = vsel %vm1230_vm4, %v904_v27, %v1256_v43  ;;  %v344_v50 = vsel %vm223_vm0, %v303_v32, -inf }
  0x6b   : > { %v1258_v28 = vsel %vm1232_vm5, %v911_v35, %v1257_v48  ;;  %v345_v34 = vmax.f32 %v343_v44, %v344_v50  ;;  %v516_v30 = vcombine.high %v342_v38, %v342_v38  ;;  %v523_v41 = vrot.slane %v342_v38, %v2909_v9 }
  0x6c   : > { %v932_v52 = vmax.f32 %v930_v36, %v931_v46  ;;  %v939_v53 = vmax.f32 %v937_v37, %v938_v47  ;;  %v1259_v54 = vsel %vm1234_vm6, %v918_v39, %v1258_v28  ;;  %v3074_v55 = vsel %vm223_vm0, %v304_v45, -inf }
  0x6d   : > { %v1260_v56 = vsel %vm1236_vm7, %v925_v42, %v1259_v54  ;;  %1580 = vrot.lane.b32.xlu1 %v3066_v49, %s2760_s16  ;;  %v530_v40 = vrot.slane %v516_v30, %v2909_v9  ;;  %v531_v57 = vcombine.high %v523_v41, %v523_v41  ;;  %v533_v58 = vcombine.high %v345_v34, %v345_v34 }
  0x6e   : > { %v1261_v59 = vsel %vm1238_vm8, %v932_v52, %v1260_v56  ;;  %v540_v60 = vrot.slane %v345_v34, %v2909_v9  ;;  %v940_v61 = vsel %vm235_vm2, %v523_v41, -inf  ;;  %v3084_v62 = vsel %vm223_vm0, %v306_v51, -inf  ;;  %v305_v56 = vld [vmem:[%s2904_s9 + $0xa8] sm:$0xff] }
  0x6f   : > { %v1262_v63 = vsel %vm1240_vm9, %v939_v53, %v1261_v59  ;;  %v532_v1 = vcombine.high %v530_v40, %v530_v40  ;;  %v547_v33 = vrot.slane %v533_v58, %v2909_v9  ;;  %v941_v2 = vrot.slane %v940_v61, 4 }
  0x70   : > { %1302 = vst.msk [vmem:[#allocation2 + $0x52] sm:$0xff] %vm223_vm0, %v1262_v63  ;;  %v548_v3 = vcombine.high %v540_v60, %v540_v60  ;;  %v947_v6 = vsel %vm235_vm2, %v531_v57, -inf  ;;  %v954_v7 = vsel %vm235_vm2, %v530_v40, -inf  ;;  %v968_v8 = vsel %vm235_vm2, %v540_v60, -inf  ;;  %v307_v40 = vld [vmem:[%s2904_s9 + $0xb8] sm:$0xff] }
  0x71   : > { %1488 = vrot.lane.b32.xlu1 %v3066_v49, %s2757_s13  ;;  %v549_v10 = vcombine.high %v547_v33, %v547_v33  ;;  %v942_v11 = vmax.f32 %v940_v61, %v941_v2  ;;  %v948_v12 = vrot.slane %v947_v6, 4  ;;  %v955_v13 = vrot.slane %v954_v7, 4 }
  0x72   : > { %v961_v15 = vsel %vm235_vm2, %v532_v1, -inf  ;;  %v969_v16 = vrot.slane %v968_v8, 4  ;;  %v975_v17 = vsel %vm235_vm2, %v548_v3, -inf  ;;  %v982_v18 = vsel %vm235_vm2, %v547_v33, -inf }
  0x73   : > { %v943_v19 = vrot.slane %v942_v11, 2  ;;  %v949_v20 = vmax.f32 %v947_v6, %v948_v12  ;;  %v956_v4 = vmax.f32 %v954_v7, %v955_v13  ;;  %v962_v5 = vrot.slane %v961_v15, 4 }
  0x74   : > { %v970_v21 = vmax.f32 %v968_v8, %v969_v16  ;;  %v976_v22 = vrot.slane %v975_v17, 4  ;;  %v983_v23 = vrot.slane %v982_v18, 4  ;;  %v989_v24 = vsel %vm235_vm2, %v549_v10, -inf  ;;  %v308_v8 = vld [vmem:[%s2904_s9 + $0xc0] sm:$0xff]  ;;  %v310_v10 = vld [vmem:[%s2904_s9 + $0xd0] sm:$0xff] }
  0x75   : > { %1612 = vrot.lane.b32.xlu1 %v3094_v14, %s2761_s17  ;;  %v944_v25 = vmax.f32 %v942_v11, %v943_v19  ;;  %v950_v26 = vrot.slane %v949_v20, 2  ;;  %v957_v27 = vrot.slane %v956_v4, 2  ;;  %v963_v29 = vmax.f32 %v961_v15, %v962_v5 }
  0x76   : > { %v971_v31 = vrot.slane %v970_v21, 2  ;;  %v977_v32 = vmax.f32 %v975_v17, %v976_v22  ;;  %v984_v35 = vmax.f32 %v982_v18, %v983_v23  ;;  %v990_v36 = vrot.slane %v989_v24, 4 }
  0x77   : > { %v1357_v37 = vld [vmem:[#allocation2 + $0x50] sm:$0xff]  ;;  %v945_v38 = vrot.slane %v944_v25, 1  ;;  %v951_v39 = vmax.f32 %v949_v20, %v950_v26  ;;  %v958_v42 = vmax.f32 %v956_v4, %v957_v27  ;;  %v964_v43 = vrot.slane %v963_v29, 2 }
  0x78   : > { %1550 = vrot.lane.b32.xlu0 %v1357_v37, %s2759_s15  ;;  %v3103_v44 = vld [vmem:[#allocation2 + $0x52] sm:$0xff]  ;;  %v972_v45 = vmax.f32 %v970_v21, %v971_v31  ;;  %v978_v46 = vrot.slane %v977_v32, 2  ;;  %v985_v47 = vrot.slane %v984_v35, 2  ;;  %v991_v48 = vmax.f32 %v989_v24, %v990_v36 }
  0x79   : > { %1490 = vrot.lane.b32.xlu1 %v3103_v44, %s2757_s13  ;;  %v946_v50 = vmax.f32 %v944_v25, %v945_v38  ;;  %v952_v28 = vrot.slane %v951_v39, 1  ;;  %v959_v34 = vrot.slane %v958_v42, 1  ;;  %v965_v30 = vmax.f32 %v963_v29, %v964_v43  ;;  %v3107_v41 = vld [vmem:[#allocation2 + $0x54] sm:$0xff] }
  0x7a   : > { %v973_v51 = vrot.slane %v972_v45, 1  ;;  %v979_v52 = vmax.f32 %v977_v32, %v978_v46  ;;  %v986_v53 = vmax.f32 %v984_v35, %v985_v47  ;;  %v992_v54 = vrot.slane %v991_v48, 2 }
  0x7b   : > { %v953_v57 = vmax.f32 %v951_v39, %v952_v28  ;;  %v960_v58 = vmax.f32 %v958_v42, %v959_v34  ;;  %v966_v59 = vrot.slane %v965_v30, 1  ;;  %v348_v60 = vmax.f32 %v3074_v55, %v3084_v62 }
  0x7c   : > { %1458 = vrot.lane.b32.xlu0 %v1357_v37, %s2756_s12  ;;  %v974_v61 = vmax.f32 %v972_v45, %v973_v51  ;;  %v980_v63 = vrot.slane %v979_v52, 1  ;;  %v987_v1 = vrot.slane %v986_v53, 1  ;;  %v993_v33 = vmax.f32 %v991_v48, %v992_v54 }
  0x7d   : > { %1614 = vrot.lane.b32.xlu1 %v3107_v41, %s2761_s17  ;;  %v967_v2 = vmax.f32 %v965_v30, %v966_v59  ;;  %v1263_v3 = vsel %vm1228_vm3, %v953_v57, %v946_v50  ;;  %v349_v6 = vsel %vm223_vm0, %v305_v56, -inf  ;;  %v350_v7 = vsel %vm223_vm0, %v307_v40, -inf }
  0x7e   : > { %v981_v11 = vmax.f32 %v979_v52, %v980_v63  ;;  %v988_v55 = vmax.f32 %v986_v53, %v987_v1  ;;  %v994_v62 = vrot.slane %v993_v33, 1  ;;  %v1264_v12 = vsel %vm1230_vm4, %v960_v58, %v1263_v3 }
  0x7f   : > { %v1265_v13 = vsel %vm1232_vm5, %v967_v2, %v1264_v12  ;;  %v351_v15 = vmax.f32 %v349_v6, %v350_v7  ;;  %v550_v16 = vcombine.high %v348_v60, %v348_v60  ;;  %v557_v17 = vrot.slane %v348_v60, %v2909_v9 }
  0x80   : > { %1582 = vrot.lane.b32.xlu0 %v3103_v44, %s2760_s16  ;;  %v995_v18 = vmax.f32 %v993_v33, %v994_v62  ;;  %v1266_v19 = vsel %vm1234_vm6, %v974_v61, %v1265_v13  ;;  %v352_v20 = vsel %vm223_vm0, %v308_v8, -inf  ;;  %v353_v4 = vsel %vm223_vm0, %v310_v10, -inf }
  0x81   : > { %1428 = vrot.lane.b32.xlu1 %v3094_v14, %s2754_s10  ;;  %v1267_v5 = vsel %vm1236_vm7, %v981_v11, %v1266_v19  ;;  %v564_v21 = vrot.slane %v550_v16, %v2909_v9  ;;  %v565_v22 = vcombine.high %v557_v17, %v557_v17  ;;  %v567_v23 = vcombine.high %v351_v15, %v351_v15 }
  0x82   : > { %v1268_v24 = vsel %vm1238_vm8, %v988_v55, %v1267_v5  ;;  %v574_v25 = vrot.slane %v351_v15, %v2909_v9  ;;  %v996_v26 = vsel %vm235_vm2, %v557_v17, -inf  ;;  %v3136_v27 = vmax.f32 %v352_v20, %v353_v4  ;;  %v309_v55 = vld [vmem:[%s2904_s9 + $0xc8] sm:$0xff]  ;;  %v311_v20 = vld [vmem:[%s2904_s9 + $0xd8] sm:$0xff] }
  0x83   : > { %v1269_v29 = vsel %vm1240_vm9, %v995_v18, %v1268_v24  ;;  %v566_v31 = vcombine.high %v564_v21, %v564_v21  ;;  %v581_v32 = vrot.slane %v567_v23, %v2909_v9  ;;  %v997_v35 = vrot.slane %v996_v26, 4 }
  0x84   : > { %1396 = vrot.lane.b32.xlu0 %v3066_v49, %s2755_s11  ;;  %1303 = vst.msk [vmem:[#allocation2 + $0x62] sm:$0xff] %vm223_vm0, %v1269_v29  ;;  %v582_v36 = vcombine.high %v574_v25, %v574_v25  ;;  %v1003_v37 = vsel %vm235_vm2, %v565_v22, -inf  ;;  %v1010_v38 = vsel %vm235_vm2, %v564_v21, -inf  ;;  %v1024_v39 = vsel %vm235_vm2, %v574_v25, -inf }
  0x85   : > { %v583_v42 = vcombine.high %v581_v32, %v581_v32  ;;  %v998_v43 = vmax.f32 %v996_v26, %v997_v35  ;;  %v1004_v45 = vrot.slane %v1003_v37, 4  ;;  %v1011_v46 = vrot.slane %v1010_v38, 4 }
  0x86   : > { %v1017_v47 = vsel %vm235_vm2, %v566_v31, -inf  ;;  %v1025_v48 = vrot.slane %v1024_v39, 4  ;;  %v1031_v50 = vsel %vm235_vm2, %v582_v36, -inf  ;;  %v1038_v49 = vsel %vm235_vm2, %v581_v32, -inf  ;;  %v312_v36 = vld [vmem:[%s2904_s9 + $0xe0] sm:$0xff] }
  0x87   : > { %v999_v28 = vrot.slane %v998_v43, 2  ;;  %v1005_v34 = vmax.f32 %v1003_v37, %v1004_v45  ;;  %v1012_v30 = vmax.f32 %v1010_v38, %v1011_v46  ;;  %v1018_v51 = vrot.slane %v1017_v47, 4  ;;  %v314_v37 = vld [vmem:[%s2904_s9 + $0xf0] sm:$0xff] }
  0x88   : > { %1520 = vrot.lane.b32.xlu0 %v3094_v14, %s2758_s14  ;;  %v1026_v52 = vmax.f32 %v1024_v39, %v1025_v48  ;;  %v1032_v53 = vrot.slane %v1031_v50, 4  ;;  %v1039_v54 = vrot.slane %v1038_v49, 4  ;;  %v1045_v56 = vsel %vm235_vm2, %v583_v42, -inf }
  0x89   : > { %v1000_v40 = vmax.f32 %v998_v43, %v999_v28  ;;  %v1006_v57 = vrot.slane %v1005_v34, 2  ;;  %v1013_v58 = vrot.slane %v1012_v30, 2  ;;  %v1019_v59 = vmax.f32 %v1017_v47, %v1018_v51 }
  0x8a   : > { %v1027_v60 = vrot.slane %v1026_v52, 2  ;;  %v1033_v61 = vmax.f32 %v1031_v50, %v1032_v53  ;;  %v1040_v63 = vmax.f32 %v1038_v49, %v1039_v54  ;;  %v1046_v1 = vrot.slane %v1045_v56, 4 }
  0x8b   : > { %v3152_v33 = vld [vmem:[#allocation2 + $0x60] sm:$0xff]  ;;  %v1001_v2 = vrot.slane %v1000_v40, 1  ;;  %v1007_v3 = vmax.f32 %v1005_v34, %v1006_v57  ;;  %v1014_v6 = vmax.f32 %v1012_v30, %v1013_v58  ;;  %v1020_v14 = vrot.slane %v1019_v59, 2 }
  0x8c   : > { %1398 = vrot.lane.b32.xlu0 %v3103_v44, %s2755_s11  ;;  %1552 = vrot.lane.b32.xlu1 %v3152_v33, %s2759_s15  ;;  %v1028_v7 = vmax.f32 %v1026_v52, %v1027_v60  ;;  %v1034_v8 = vrot.slane %v1033_v61, 2  ;;  %v1041_v10 = vrot.slane %v1040_v63, 2  ;;  %v1047_v11 = vmax.f32 %v1045_v56, %v1046_v1  ;;  %v3166_v31 = vld [vmem:[#allocation2 + $0x62] sm:$0xff] }
  0x8d   : > { %v1002_v62 = vmax.f32 %v1000_v40, %v1001_v2  ;;  %v1008_v12 = vrot.slane %v1007_v3, 1  ;;  %v1015_v13 = vrot.slane %v1014_v6, 1  ;;  %v1021_v15 = vmax.f32 %v1019_v59, %v1020_v14  ;;  %v3201_v2 = vld [vmem:[#allocation2 + $0x64] sm:$0xff] }
  0x8e   : > { %v1029_v16 = vrot.slane %v1028_v7, 1  ;;  %v1035_v17 = vmax.f32 %v1033_v61, %v1034_v8  ;;  %v1042_v18 = vmax.f32 %v1040_v63, %v1041_v10  ;;  %v1048_v19 = vrot.slane %v1047_v11, 2 }
  0x8f   : > { %v1009_v4 = vmax.f32 %v1007_v3, %v1008_v12  ;;  %v1016_v44 = vmax.f32 %v1014_v6, %v1015_v13  ;;  %v1022_v5 = vrot.slane %v1021_v15, 1  ;;  %v355_v21 = vsel %vm223_vm0, %v309_v55, -inf }
  0x90   : > { %1522 = vrot.lane.b32.xlu0 %v3107_v41, %s2758_s14  ;;  %1460 = vrot.lane.b32.xlu1 %v3152_v33, %s2756_s12  ;;  %v1030_v22 = vmax.f32 %v1028_v7, %v1029_v16  ;;  %v1036_v23 = vrot.slane %v1035_v17, 1  ;;  %v1043_v24 = vrot.slane %v1042_v18, 1  ;;  %v1049_v25 = vmax.f32 %v1047_v11, %v1048_v19 }
  0x91   : > { %v1023_v26 = vmax.f32 %v1021_v15, %v1022_v5  ;;  %v1270_v29 = vsel %vm1228_vm3, %v1009_v4, %v1002_v62  ;;  %v356_v32 = vsel %vm223_vm0, %v311_v20, -inf  ;;  %v584_v35 = vcombine.high %v3136_v27, %v3136_v27 }
  0x92   : > { %v1037_v38 = vmax.f32 %v1035_v17, %v1036_v23  ;;  %v1044_v39 = vmax.f32 %v1042_v18, %v1043_v24  ;;  %v1050_v42 = vrot.slane %v1049_v25, 1  ;;  %v1271_v43 = vsel %vm1230_vm4, %v1016_v44, %v1270_v29 }
  0x93   : > { %v1272_v45 = vsel %vm1232_vm5, %v1023_v26, %v1271_v43  ;;  %v357_v46 = vmax.f32 %v355_v21, %v356_v32  ;;  %v591_v47 = vrot.slane %v3136_v27, %v2909_v9  ;;  %v598_v48 = vrot.slane %v584_v35, %v2909_v9 }
  0x94   : > { %1430 = vrot.lane.b32.xlu0 %v3107_v41, %s2754_s10  ;;  %v1051_v50 = vmax.f32 %v1049_v25, %v1050_v42  ;;  %v1273_v49 = vsel %vm1234_vm6, %v1030_v22, %v1272_v45  ;;  %1584 = vrot.lane.b32.xlu1 %v3166_v31, %s2760_s16  ;;  %v3184_v28 = vsel %vm223_vm0, %v312_v36, -inf  ;;  %v3187_v34 = vsel %vm223_vm0, %v314_v37, -inf }
  0x95   : > { %v1274_v30 = vsel %vm1236_vm7, %v1037_v38, %v1273_v49  ;;  %v599_v27 = vcombine.high %v591_v47, %v591_v47  ;;  %v600_v51 = vcombine.high %v598_v48, %v598_v48  ;;  %v601_v52 = vcombine.high %v357_v46, %v357_v46 }
  0x96   : > { %v1275_v53 = vsel %vm1238_vm8, %v1044_v39, %v1274_v30  ;;  %v608_v41 = vrot.slane %v357_v46, %v2909_v9  ;;  %v1052_v54 = vsel %vm235_vm2, %v591_v47, -inf  ;;  %v1066_v56 = vsel %vm235_vm2, %v598_v48, -inf }
  0x97   : > { %v1276_v40 = vsel %vm1240_vm9, %v1051_v50, %v1275_v53  ;;  %v615_v57 = vrot.slane %v601_v52, %v2909_v9  ;;  %v1053_v58 = vrot.slane %v1052_v54, 4  ;;  %v1059_v59 = vsel %vm235_vm2, %v599_v27, -inf  ;;  %v313_v50 = vld [vmem:[%s2904_s9 + $0xe8] sm:$0xff]  ;;  %v315_v52 = vld [vmem:[%s2904_s9 + $0xf8] sm:$0xff] }
  0x98   : > { %1304 = vst.msk [vmem:[#allocation2 + $0x72] sm:$0xff] %vm223_vm0, %v1276_v40  ;;  %1492 = vrot.lane.b32.xlu1 %v3166_v31, %s2757_s13  ;;  %v616_v60 = vcombine.high %v608_v41, %v608_v41  ;;  %v1060_v61 = vrot.slane %v1059_v59, 4  ;;  %v1067_v63 = vrot.slane %v1066_v56, 4  ;;  %v1073_v1 = vsel %vm235_vm2, %v600_v51, -inf }
  0x99   : > { %v617_v3 = vcombine.high %v615_v57, %v615_v57  ;;  %v1054_v6 = vmax.f32 %v1052_v54, %v1053_v58  ;;  %v1074_v14 = vrot.slane %v1073_v1, 4  ;;  %v1080_v7 = vsel %vm235_vm2, %v608_v41, -inf }
  0x9a   : > { %v1061_v8 = vmax.f32 %v1059_v59, %v1060_v61  ;;  %v1068_v10 = vmax.f32 %v1066_v56, %v1067_v63  ;;  %v1081_v11 = vrot.slane %v1080_v7, 4  ;;  %v1087_v55 = vsel %vm235_vm2, %v616_v60, -inf }
  0x9b   : > { %v1055_v62 = vrot.slane %v1054_v6, 2  ;;  %v1075_v12 = vmax.f32 %v1073_v1, %v1074_v14  ;;  %v1088_v13 = vrot.slane %v1087_v55, 4  ;;  %v1094_v15 = vsel %vm235_vm2, %v615_v57, -inf }
  0x9c   : > { %1616 = vrot.lane.b32.xlu1 %v3201_v2, %s2761_s17  ;;  %v1062_v16 = vrot.slane %v1061_v8, 2  ;;  %v1069_v17 = vrot.slane %v1068_v10, 2  ;;  %v1082_v18 = vmax.f32 %v1080_v7, %v1081_v11  ;;  %v1095_v19 = vrot.slane %v1094_v15, 4 }
  0x9d   : > { %v1056_v20 = vmax.f32 %v1054_v6, %v1055_v62  ;;  %v1076_v4 = vrot.slane %v1075_v12, 2  ;;  %v1089_v44 = vmax.f32 %v1087_v55, %v1088_v13  ;;  %v1101_v5 = vsel %vm235_vm2, %v617_v3, -inf }
  0x9e   : > { %v1063_v21 = vmax.f32 %v1061_v8, %v1062_v16  ;;  %v1070_v22 = vmax.f32 %v1068_v10, %v1069_v17  ;;  %v1083_v23 = vrot.slane %v1082_v18, 2  ;;  %v1096_v24 = vmax.f32 %v1094_v15, %v1095_v19 }
  0x9f   : > { %v3209_v25 = vld [vmem:[#allocation2 + $0x70] sm:$0xff]  ;;  %v1057_v29 = vrot.slane %v1056_v20, 1  ;;  %v1077_v32 = vmax.f32 %v1075_v12, %v1076_v4  ;;  %v1090_v35 = vrot.slane %v1089_v44, 2  ;;  %v1102_v36 = vrot.slane %v1101_v5, 4 }
  0xa0   : > { %v3211_v26 = vld [vmem:[#allocation2 + $0x72] sm:$0xff]  ;;  %1554 = vrot.lane.b32.xlu0 %v3209_v25, %s2759_s15  ;;  %v1064_v37 = vrot.slane %v1063_v21, 1  ;;  %v1071_v38 = vrot.slane %v1070_v22, 1  ;;  %v1084_v39 = vmax.f32 %v1082_v18, %v1083_v23  ;;  %v1097_v42 = vrot.slane %v1096_v24, 2 }
  0xa1   : > { %1494 = vrot.lane.b32.xlu1 %v3211_v26, %s2757_s13  ;;  %v3217_v43 = vld [vmem:[#allocation2 + $0x74] sm:$0xff]  ;;  %v1058_v45 = vmax.f32 %v1056_v20, %v1057_v29  ;;  %v1078_v46 = vrot.slane %v1077_v32, 1  ;;  %v1091_v47 = vmax.f32 %v1089_v44, %v1090_v35  ;;  %v1103_v48 = vmax.f32 %v1101_v5, %v1102_v36 }
  0xa2   : > { %v1065_v49 = vmax.f32 %v1063_v21, %v1064_v37  ;;  %v1072_v30 = vmax.f32 %v1070_v22, %v1071_v38  ;;  %v1085_v27 = vrot.slane %v1084_v39, 1  ;;  %v1098_v51 = vmax.f32 %v1096_v24, %v1097_v42 }
  0xa3   : > { %v1079_v53 = vmax.f32 %v1077_v32, %v1078_v46  ;;  %v1092_v41 = vrot.slane %v1091_v47, 1  ;;  %v1104_v54 = vrot.slane %v1103_v48, 2  ;;  %v360_v56 = vmax.f32 %v3184_v28, %v3187_v34 }
  0xa4   : > { %1462 = vrot.lane.b32.xlu0 %v3209_v25, %s2756_s12  ;;  %v1086_v40 = vmax.f32 %v1084_v39, %v1085_v27  ;;  %v1099_v57 = vrot.slane %v1098_v51, 1  ;;  %v1277_v58 = vsel %vm1228_vm3, %v1065_v49, %v1058_v45  ;;  %v361_v59 = vsel %vm223_vm0, %v313_v50, -inf }
  0xa5   : > { %1618 = vrot.lane.b32.xlu1 %v3217_v43, %s2761_s17  ;;  %v1093_v60 = vmax.f32 %v1091_v47, %v1092_v41  ;;  %v1105_v61 = vmax.f32 %v1103_v48, %v1104_v54  ;;  %v1278_v63 = vsel %vm1230_vm4, %v1072_v30, %v1277_v58  ;;  %v362_v1 = vsel %vm223_vm0, %v315_v52, -inf }
  0xa6   : > { %v1100_v3 = vmax.f32 %v1098_v51, %v1099_v57  ;;  %v1279_v28 = vsel %vm1232_vm5, %v1079_v53, %v1278_v63  ;;  %v363_v34 = vmax.f32 %v361_v59, %v362_v1  ;;  %v618_v6 = vcombine.high %v360_v56, %v360_v56 }
  0xa7   : > { %v1106_v14 = vrot.slane %v1105_v61, 1  ;;  %v1280_v7 = vsel %vm1234_vm6, %v1086_v40, %v1279_v28  ;;  %v625_v8 = vrot.slane %v360_v56, %v2909_v9 }
  0xa8   : > { %1586 = vrot.lane.b32.xlu0 %v3211_v26, %s2760_s16  ;;  %v1281_v10 = vsel %vm1236_vm7, %v1093_v60, %v1280_v7  ;;  %v632_v11 = vrot.slane %v618_v6, %v2909_v9  ;;  %v635_v55 = vcombine.high %v363_v34, %v363_v34  ;;  %v642_v15 = vrot.slane %v363_v34, %v2909_v9 }
  0xa9   : > { %1432 = vrot.lane.b32.xlu1 %v3201_v2, %s2754_s10  ;;  %v1107_v62 = vmax.f32 %v1105_v61, %v1106_v14  ;;  %v1282_v12 = vsel %vm1238_vm8, %v1100_v3, %v1281_v10  ;;  %v633_v13 = vcombine.high %v625_v8, %v625_v8  ;;  %v1108_v18 = vsel %vm235_vm2, %v625_v8, -inf  ;;  %v3257_v61 = vpop.permute.xlu1 %1420 }
  0xaa   : > { %v634_v16 = vcombine.high %v632_v11, %v632_v11  ;;  %v649_v17 = vrot.slane %v635_v55, %v2909_v9  ;;  %v1122_v19 = vsel %vm235_vm2, %v632_v11, -inf  ;;  %v650_v4 = vcombine.high %v642_v15, %v642_v15 }
  0xab   : > { %v1283_v20 = vsel %vm1240_vm9, %v1107_v62, %v1282_v12  ;;  %v1109_v44 = vrot.slane %v1108_v18, 4  ;;  %v1115_v5 = vsel %vm235_vm2, %v633_v13, -inf  ;;  %v1123_v23 = vrot.slane %v1122_v19, 4 }
  0xac   : > { %1400 = vrot.lane.b32.xlu0 %v3166_v31, %s2755_s11  ;;  %1305 = vst.msk [vmem:[#allocation2 + $0x82] sm:$0xff] %vm223_vm0, %v1283_v20  ;;  %v651_v21 = vcombine.high %v649_v17, %v649_v17  ;;  %v1116_v22 = vrot.slane %v1115_v5, 4  ;;  %v1129_v9 = vsel %vm235_vm2, %v634_v16, -inf  ;;  %v1136_v32 = vsel %vm235_vm2, %v642_v15, -inf }
  0xad   : > { %v1110_v24 = vmax.f32 %v1108_v18, %v1109_v44  ;;  %v1130_v29 = vrot.slane %v1129_v9, 4  ;;  %v1143_v35 = vsel %vm235_vm2, %v650_v4, -inf  ;;  %v1124_v37 = vmax.f32 %v1122_v19, %v1123_v23  ;;  %v3267_v20 = vpop.permute.xlu1 %1422  ;;  %v1707_v4 = vld [vmem:[%s3731_s1] sm:$0xff]  ;;  %v1708_v44 = vld [vmem:[%s3731_s1 + $0x8] sm:$0xff]  ;;  %v1710_v23 = vld [vmem:[%s3731_s1 + $0x18] sm:$0xff] }
  0xae   : > { %v1117_v36 = vmax.f32 %v1115_v5, %v1116_v22  ;;  %v1137_v38 = vrot.slane %v1136_v32, 4  ;;  %v1144_v39 = vrot.slane %v1143_v35, 4  ;;  %v1150_v31 = vsel %vm235_vm2, %v649_v17, -inf  ;;  %v1709_v22 = vld [vmem:[%s3731_s1 + $0x10] sm:$0xff] }
  0xaf   : > { %v1111_v42 = vrot.slane %v1110_v24, 2  ;;  %v1131_v45 = vmax.f32 %v1129_v9, %v1130_v29  ;;  %v1157_v46 = vsel %vm235_vm2, %v651_v21, -inf  ;;  %v1125_v48 = vrot.slane %v1124_v37, 2  ;;  %v3276_v21 = vpop.permute.xlu0 %1388 }
  0xb0   : > { %1524 = vrot.lane.b32.xlu0 %v3201_v2, %s2758_s14  ;;  %v1118_v47 = vrot.slane %v1117_v36, 2  ;;  %v1138_v50 = vmax.f32 %v1136_v32, %v1137_v38  ;;  %v1145_v49 = vmax.f32 %v1143_v35, %v1144_v39  ;;  %v1151_v51 = vrot.slane %v1150_v31, 4 }
  0xb1   : > { %v1112_v30 = vmax.f32 %v1110_v24, %v1111_v42  ;;  %v1132_v27 = vrot.slane %v1131_v45, 2  ;;  %v1158_v52 = vrot.slane %v1157_v46, 4  ;;  %v1126_v41 = vmax.f32 %v1124_v37, %v1125_v48  ;;  %v3292_v39 = vpop.permute.xlu1 %1454 }
  0xb2   : > { %v1119_v53 = vmax.f32 %v1117_v36, %v1118_v47  ;;  %v1139_v54 = vrot.slane %v1138_v50, 2  ;;  %v1146_v56 = vrot.slane %v1145_v49, 2  ;;  %v1152_v59 = vmax.f32 %v1150_v31, %v1151_v51  ;;  %v1371_v51 = vld [vmem:[#allocation2 + $0xb2] sm:$0xff] }
  0xb3   : > { %v1360_v40 = vld [vmem:[#allocation2 + $0x80] sm:$0xff]  ;;  %v1113_v57 = vrot.slane %v1112_v30, 1  ;;  %v1133_v58 = vmax.f32 %v1131_v45, %v1132_v27  ;;  %v1159_v60 = vmax.f32 %v1157_v46, %v1158_v52  ;;  %v1127_v63 = vrot.slane %v1126_v41, 1  ;;  %v3295_v42 = vpop.permute.xlu0 %1390  ;;  %v1363_v27 = vld [vmem:[#allocation2 + $0xb0] sm:$0xff] }
  0xb4   : > { %1402 = vrot.lane.b32.xlu0 %v3211_v26, %s2755_s11  ;;  %1556 = vrot.lane.b32.xlu1 %v1360_v40, %s2759_s15  ;;  %v1120_v2 = vrot.slane %v1119_v53, 1  ;;  %v1140_v1 = vmax.f32 %v1138_v50, %v1139_v54  ;;  %v1147_v3 = vmax.f32 %v1145_v49, %v1146_v56  ;;  %v1153_v6 = vrot.slane %v1152_v59, 2  ;;  %v1368_v19 = vld [vmem:[#allocation2 + $0x82] sm:$0xff] }
  0xb5   : > { %v1114_v28 = vmax.f32 %v1112_v30, %v1113_v57  ;;  %v1134_v34 = vrot.slane %v1133_v58, 1  ;;  %v1160_v14 = vrot.slane %v1159_v60, 2  ;;  %v1128_v8 = vmax.f32 %v1126_v41, %v1127_v63  ;;  %v1711_v45 = vld [vmem:[%s3731_s1 + $0x20] sm:$0xf]  ;;  %v1379_v41 = vld [vmem:[#allocation2 + $0xb4] sm:$0xff] }
  0xb6   : > { %v1121_v7 = vmax.f32 %v1119_v53, %v1120_v2  ;;  %v1141_v10 = vrot.slane %v1140_v1, 1  ;;  %v1148_v11 = vrot.slane %v1147_v3, 1  ;;  %v1154_v62 = vmax.f32 %v1152_v59, %v1153_v6  ;;  %v1362_v56 = vld [vmem:[#allocation2 + $0xa0] sm:$0xff] }
  0xb7   : > { %v1135_v55 = vmax.f32 %v1133_v58, %v1134_v34  ;;  %v1161_v12 = vmax.f32 %v1159_v60, %v1160_v14  ;;  %v2623_v35 = vpack.c.bf16 %v1708_v44, %v1707_v4  ;;  %v2627_v37 = vpack.c.bf16 %v1710_v23, %v1709_v22  ;;  %v1307_v58 = vld [vmem:[#allocation2] sm:$0xff]  ;;  %v1886_v34 = vld [vmem:[#allocation3 + $0x16] sm:$0xff] }
  0xb8   : > { %1526 = vrot.lane.b32.xlu0 %v3217_v43, %s2758_s14  ;;  %1464 = vrot.lane.b32.xlu1 %v1360_v40, %s2756_s12  ;;  %v1142_v26 = vmax.f32 %v1140_v1, %v1141_v10  ;;  %v1149_v13 = vmax.f32 %v1147_v3, %v1148_v11  ;;  %v1284_v15 = vsel %vm1228_vm3, %v1121_v7, %v1114_v28  ;;  %v1155_v16 = vrot.slane %v1154_v62, 1  ;;  %v1370_v59 = vld [vmem:[#allocation2 + $0xa2] sm:$0xff]  ;;  %v1878_v3 = vld [vmem:[#allocation3 + $0x13] sm:$0xff] }
  0xb9   : > { %v1162_v17 = vrot.slane %v1161_v12, 1  ;;  %v1285_v18 = vsel %vm1230_vm4, %v1128_v8, %v1284_v15  ;;  %2624 = vmatprep.subr.bf16.mxu0 %v2623_v35  ;;  %v1636_v2 = vsel %vm223_vm0, %v1307_v58, %v3276_v21  ;;  %v1378_v1 = vld [vmem:[#allocation2 + $0xa4] sm:$0xff]  ;;  %vm1689_vm2 = vcmask 228352  }
  0xba   : > { %v1286_v5 = vsel %vm1232_vm5, %v1135_v55, %v1285_v18  ;;  %v1156_v9 = vmax.f32 %v1154_v62, %v1155_v16  ;;  %2626 = vmatpush3.bf16.msra.mxu0 %v2623_v35  ;;  %v1645_v28 = vsel %vm1644_vm12, %v1636_v2, %v3257_v61  ;;  %v1877_v10 = vld [vmem:[#allocation3 + $0x3] sm:$0xff]  ;;  %vm1698_vm3 = vcmask 261120   ;;  %v1923_v18 = vld [vmem:[#allocation3 + $0xb0] sm:$0xff] }
  0xbb   : > { %v1163_v24 = vmax.f32 %v1161_v12, %v1162_v17  ;;  %v1287_v29 = vsel %vm1234_vm6, %v1142_v26, %v1286_v5  ;;  %2628 = vmatprep.subr.bf16.mxu0 %v2627_v37  ;;  %vm1719_vm4 = vcmask 293888   ;;  %v1308_v12 = vld [vmem:[#allocation2 + $0x10] sm:$0xff]  ;;  %vm267_vm5 = vcmask 26624  }
  0xbc   : > { %1434 = vrot.lane.b32.xlu0 %v3217_v43, %s2754_s10  ;;  %v1288_v32 = vsel %vm1236_vm7, %v1149_v13, %v1287_v29  ;;  %1588 = vrot.lane.b32.xlu1 %v1368_v19, %s2760_s16  ;;  %v1376_v43 = vld [vmem:[#allocation2 + $0x84] sm:$0xff]  ;;  %v1637_v16 = vsel %vm223_vm0, %v1308_v12, %v3295_v42  ;;  %269 = vst.msk [vmem:[#allocation3 + $0x40] sm:$0x7] %vm267_vm5, %v2752_v0  ;;  %268 = vst.msk [vmem:[#allocation3 + $0x30] sm:$0x7] %vm267_vm5, %v2752_v0 }
  0xbd   : > { %v1289_v36 = vsel %vm1238_vm8, %v1156_v9, %v1288_v32  ;;  %v1885_v13 = vld [vmem:[#allocation3 + $0x6] sm:$0xff]  ;;  %270 = vst.msk [vmem:[#allocation3 + $0x50] sm:$0x7] %vm267_vm5, %v2752_v0  ;;  %271 = vst.msk [vmem:[#allocation3 + $0x60] sm:$0x7] %vm267_vm5, %v2752_v0 }
  0xbe   : > { %v1290_v38 = vsel %vm1240_vm9, %v1163_v24, %v1289_v36  ;;  %2630 = vmatpush3.bf16.msra.mxu0 %v2627_v37  ;;  %272 = vst.msk [vmem:[#allocation3 + $0x70] sm:$0x7] %vm267_vm5, %v2752_v0  ;;  %273 = vst.msk [vmem:[#allocation3 + $0x80] sm:$0x7] %vm267_vm5, %v2752_v0 }
  0xbf   : > { %1306 = vst.msk [vmem:[#allocation2 + $0x92] sm:$0xff] %vm223_vm0, %v1290_v38  ;;  %2587 = vmatprep.subr.msk.mxu0 %vm1744_vm10, %v1711_v45 }
  0xc0   : > { %1496 = vrot.lane.b32.xlu1 %v1368_v19, %s2757_s13  ;;  %v1646_v19 = vsel %vm1644_vm12, %v1637_v16, %v3267_v20  ;;  %274 = vst.msk [vmem:[#allocation3 + $0x90] sm:$0x7] %vm267_vm5, %v2752_v0  ;;  %275 = vst.msk [vmem:[#allocation3 + $0xa0] sm:$0x7] %vm267_vm5, %v2752_v0 }
  0xc1   : > { %v1655_v44 = vsel %vm1653_vm13, %v1646_v19, %v3292_v39  ;;  %v1309_v39 = vld [vmem:[#allocation2 + $0x20] sm:$0xff]  ;;  %276 = vst.msk [vmem:[#allocation3 + $0x3b] sm:$0x7] %vm267_vm5, %v2752_v0  ;;  %277 = vst.msk [vmem:[#allocation3 + $0x4b] sm:$0x7] %vm267_vm5, %v2752_v0 }
  0xc2   : > { %2588 = vmatpush3.msk.msra.mxu0 %vm1744_vm10, %v1711_v45  ;;  %278 = vst.msk [vmem:[#allocation3 + $0x5b] sm:$0x7] %vm267_vm5, %v2752_v0  ;;  %279 = vst.msk [vmem:[#allocation3 + $0x6b] sm:$0x7] %vm267_vm5, %v2752_v0 }
  0xc3   : > { %v1453_v47 = vpop.permute.xlu0 %1452  ;;  %280 = vst.msk [vmem:[#allocation3 + $0x7b] sm:$0x7] %vm267_vm5, %v2752_v0  ;;  %281 = vst.msk [vmem:[#allocation3 + $0x8b] sm:$0x7] %vm267_vm5, %v2752_v0 }
  0xc4   : > { %1620 = vrot.lane.b32.xlu1 %v1376_v43, %s2761_s17  ;;  %v3302_v31 = vpop.permute.xlu1 %1392  ;;  %v1654_v6 = vsel %vm1653_vm13, %v1645_v28, %v1453_v47  ;;  %282 = vst.msk [vmem:[#allocation3 + $0x9b] sm:$0x7] %vm267_vm5, %v2752_v0  ;;  %283 = vst.msk [vmem:[#allocation3 + $0xab] sm:$0x7] %vm267_vm5, %v2752_v0 }
  0xc5   : > { %v1638_v45 = vsel %vm223_vm0, %v1309_v39, %v3302_v31  ;;  %v1310_v31 = vld [vmem:[#allocation2 + $0x30] sm:$0xff] }
  0xc6   : > { %v1361_v46 = vld [vmem:[#allocation2 + $0x90] sm:$0xff] }
  0xc7   : > { %1558 = vrot.lane.b32.xlu0 %v1361_v46, %s2759_s15  ;;  %v1377_v48 = vld [vmem:[#allocation2 + $0x94] sm:$0xff]  ;;  %v1485_v30 = vpop.permute.xlu0 %1484 }
  0xc8   : > { %1528 = vrot.lane.b32.xlu1 %v1376_v43, %s2758_s14  ;;  %v1517_v50 = vpop.permute.xlu1 %1516  ;;  %v1369_v49 = vld [vmem:[#allocation2 + $0x92] sm:$0xff]  ;;  %v1663_v7 = vsel %vm1662_vm14, %v1654_v6, %v1485_v30 }
  0xc9   : > { %v1672_v11 = vsel %vm1671_vm15, %v1663_v7, %v1517_v50 }
  0xcb   : > { %1466 = vrot.lane.b32.xlu0 %v1361_v46, %s2756_s12  ;;  %v3313_v53 = vpop.permute.xlu0 %1486 }
  0xcc   : > { %1530 = vrot.lane.b32.xlu1 %v1377_v48, %s2758_s14  ;;  %v3311_v52 = vpop.permute.xlu1 %1424  ;;  %v1664_v5 = vsel %vm1662_vm14, %v1655_v44, %v3313_v53 }
  0xcd   : > { %v1647_v46 = vsel %vm1644_vm12, %v1638_v45, %v3311_v52 }
  0xcf   : > { %1590 = vrot.lane.b32.xlu0 %v1369_v49, %s2760_s16  ;;  %v3319_v40 = vpop.permute.xlu0 %1394 }
  0xd0   : > { %1562 = vrot.lane.b32.xlu1 %v1363_v27, %s2759_s15 }
  0xd3   : > { %1498 = vrot.lane.b32.xlu0 %v1369_v49, %s2757_s13  ;;  %v1519_v60 = vpop.permute.xlu0 %1518 }
  0xd4   : > { %1594 = vrot.lane.b32.xlu1 %v1371_v51, %s2760_s16  ;;  %v1673_v21 = vsel %vm1671_vm15, %v1664_v5, %v1519_v60 }
  0xd7   : > { %1622 = vrot.lane.b32.xlu0 %v1377_v48, %s2761_s17  ;;  %v1549_v54 = vpop.permute.xlu1 %1548  ;;  %v1427_v8 = vpop.permute.xlu0 %1426 }
  0xd8   : > { %1626 = vrot.lane.b32.xlu1 %v1379_v41, %s2761_s17  ;;  %v1681_v61 = vsel %vm1680_vm1, %v1672_v11, %v1549_v54  ;;  %v1311_v11 = vld [vmem:[#allocation2 + $0x40] sm:$0xff] }
  0xdb   : > { %1560 = vrot.lane.b32.xlu0 %v1362_v56, %s2759_s15  ;;  %v3328_v57 = vpop.permute.xlu1 %1456  ;;  %v1639_v56 = vsel %vm223_vm0, %v1310_v31, %v3319_v40 }
  0xdc   : > { %1952 = vrot.lane.b32.xlu1 %v1878_v3, %s2755_s11  ;;  %v1656_v47 = vsel %vm1653_vm13, %v1647_v46, %v3328_v57  ;;  %v1648_v57 = vsel %vm1644_vm12, %v1639_v56, %v1427_v8 }
  0xdf   : > { %1592 = vrot.lane.b32.xlu0 %v1370_v59, %s2760_s16  ;;  %v1581_v63 = vpop.permute.xlu1 %1580 }
  0xe0   : > { %1984 = vrot.lane.b32.xlu1 %v1886_v34, %s2754_s10  ;;  %v1690_v55 = vsel %vm1689_vm2, %v1681_v61, %v1581_v63 }
  0xe3   : > { %1624 = vrot.lane.b32.xlu0 %v1378_v1, %s2761_s17  ;;  %v1489_v14 = vpop.permute.xlu1 %1488 }
  0xe4   : > { %v1665_v50 = vsel %vm1662_vm14, %v1656_v47, %v1489_v14 }
  0xe7   : > { %v1613_v62 = vpop.permute.xlu1 %1612  ;;  %1950 = vrot.lane.b32.xlu0 %v1877_v10, %s2755_s11 }
  0xe8   : > { %v1699_v26 = vsel %vm1698_vm3, %v1690_v55, %v1613_v62 }
  0xe9   : > { %2589 = vmatprep.mubr.msk.f32.mxu0 %vm1719_vm4, %v1699_v26 }
  0xea   : > { %v1551_v15 = vpop.permute.xlu0 %1550 }
  0xeb   : > { %v1491_v17 = vpop.permute.xlu1 %1490  ;;  %1982 = vrot.lane.b32.xlu0 %v1885_v13, %s2754_s10  ;;  %v1682_v23 = vsel %vm1680_vm1, %v1673_v21, %v1551_v15 }
  0xee   : > { %v1459_v4 = vpop.permute.xlu0 %1458 }
  0xef   : > { %2120 = vrot.lane.b32.xlu0 %v1923_v18, %s2759_s15  ;;  %v1615_v22 = vpop.permute.xlu1 %1614  ;;  %v1657_v59 = vsel %vm1653_vm13, %v1648_v57, %v1459_v4 }
  0xf0   : > { %v1666_v60 = vsel %vm1662_vm14, %v1657_v59, %v1491_v17 }
  0xf2   : > { %v1583_v9 = vpop.permute.xlu0 %1582 }
  0xf3   : > { %v1691_v24 = vsel %vm1689_vm2, %v1682_v23, %v1583_v9  ;;  %v1429_v32 = vpop.permute.xlu1 %1428  ;;  %v1312_v23 = vld [vmem:[#allocation2 + $0x50] sm:$0xff] }
  0xf4   : > { %v1700_v29 = vsel %vm1698_vm3, %v1691_v24, %v1615_v22 }
  0xf5   : > { %2590 = vmatmul.mubr.msk.f32.vlgmr.msra.gmra.mrb[0].mxu0 %vm1719_vm4, %v1700_v29 }
  0xf6   : > { %v1397_v20 = vpop.permute.xlu0 %1396 }
  0xf7   : > { %v1640_v62 = vsel %vm223_vm0, %v1311_v11, %v1397_v20 }
  0xf8   : > { %v1649_v12 = vsel %vm1644_vm12, %v1640_v62, %v1429_v32 }
  0xfa   : > { %v1521_v35 = vpop.permute.xlu0 %1520 }
  0xfb   : > { %v1674_v49 = vsel %vm1671_vm15, %v1665_v50, %v1521_v35  ;;  %v1879_v50 = vld [vmem:[#allocation3 + $0x23] sm:$0xff] }
  0xfc   : > { %1954 = vrot.lane.b32.xlu1 %v1879_v50, %s2755_s11 }
  0xfe   : > { %v1553_v36 = vpop.permute.xlu1 %1552  ;;  %v1399_v37 = vpop.permute.xlu0 %1398 }
  0xff   : > { %v1683_v27 = vsel %vm1680_vm1, %v1674_v49, %v1553_v36  ;;  %v1641_v29 = vsel %vm223_vm0, %v1312_v23, %v1399_v37 }
 0x102   : > { %v1461_v38 = vpop.permute.xlu1 %1460  ;;  %v1523_v42 = vpop.permute.xlu0 %1522 }
 0x103   : > { %v1675_v2 = vsel %vm1671_vm15, %v1666_v60, %v1523_v42  ;;  %v1658_v26 = vsel %vm1653_vm13, %v1649_v12, %v1461_v38  ;;  %v1924_v60 = vld [vmem:[#allocation3 + $0xc0] sm:$0xff] }
 0x106   : > { %v1585_v43 = vpop.permute.xlu1 %1584  ;;  %v1431_v30 = vpop.permute.xlu0 %1430 }
 0x107   : > { %v1692_v51 = vsel %vm1689_vm2, %v1683_v27, %v1585_v43  ;;  %v1650_v20 = vsel %vm1644_vm12, %v1641_v29, %v1431_v30 }
 0x10a   : > { %v1493_v48 = vpop.permute.xlu1 %1492 }
 0x10b   : > { %v1667_v15 = vsel %vm1662_vm14, %v1658_v26, %v1493_v48  ;;  %v1931_v48 = vld [vmem:[#allocation3 + $0xb3] sm:$0xff] }
 0x10c   : > { %2152 = vrot.lane.b32.xlu0 %v1931_v48, %s2760_s16 }
 0x10e   : > { %v1617_v53 = vpop.permute.xlu1 %1616 }
 0x10f   : > { %v1701_v41 = vsel %vm1698_vm3, %v1692_v51, %v1617_v53  ;;  %v1939_v51 = vld [vmem:[#allocation3 + $0xb6] sm:$0xff]  ;;  %v1887_v53 = vld [vmem:[#allocation3 + $0x26] sm:$0xff] }
 0x110   : > { %2592 = vmatprep.mubr.msk.f32.mxu0 %vm1719_vm4, %v1701_v41  ;;  %2184 = vrot.lane.b32.xlu0 %v1939_v51, %s2761_s17 }
 0x111   : > { %1986 = vrot.lane.b32.xlu1 %v1887_v53, %s2754_s10  ;;  %v2264_v53 = vld [vmem:[%s3733_s3 + $0x10] sm:$0xff] }
 0x112   : > { %v1555_v52 = vpop.permute.xlu0 %1554 }
 0x113   : > { %v1495_v54 = vpop.permute.xlu1 %1494  ;;  %v1684_v1 = vsel %vm1680_vm1, %v1675_v2, %v1555_v52  ;;  %v1925_v2 = vld [vmem:[#allocation3 + $0xd0] sm:$0xff] }
 0x114   : > { %2122 = vrot.lane.b32.xlu0 %v1924_v60, %s2759_s15 }
 0x115   : > { %2124 = vrot.lane.b32.xlu1 %v1925_v2, %s2759_s15 }
 0x116   : > { %v1463_v58 = vpop.permute.xlu0 %1462 }
 0x117   : > { %v1619_v63 = vpop.permute.xlu1 %1618  ;;  %v1659_v32 = vsel %vm1653_vm13, %v1650_v20, %v1463_v58 }
 0x118   : > { %v1668_v36 = vsel %vm1662_vm14, %v1659_v32, %v1495_v54 }
 0x11a   : > { %v1587_v3 = vpop.permute.xlu0 %1586 }
 0x11b   : > { %v1693_v28 = vsel %vm1689_vm2, %v1684_v1, %v1587_v3  ;;  %v1433_v6 = vpop.permute.xlu1 %1432 }
 0x11c   : > { %v1702_v34 = vsel %vm1698_vm3, %v1693_v28, %v1619_v63 }
 0x11d   : > { %2593 = vmatmul.mubr.msk.f32.gmra.mrb[2].mxu0 %vm1719_vm4, %v1702_v34 }
 0x11e   : > { %v1401_v40 = vpop.permute.xlu0 %1400 }
 0x11f   : > { %v1642_v30 = vsel %vm223_vm0, %v3152_v33, %v1401_v40 }
 0x120   : > { %v1651_v41 = vsel %vm1644_vm12, %v1642_v30, %v1433_v6  ;;  %v3462_v6 = vld [vmem:[%s3732_s2] ss:$0 sm:$0xff]  ;;  %v2263_v30 = vld [vmem:[%s3733_s3 + $0x8] sm:$0xff] }
 0x122   : > { %v1525_v14 = vpop.permute.xlu0 %1524 }
 0x123   : > { %v1676_v17 = vsel %vm1671_vm15, %v1667_v15, %v1525_v14  ;;  %v1870_v14 = vld [vmem:[#allocation3 + $0x10] sm:$0xff] }
 0x126   : > { %v1557_v7 = vpop.permute.xlu1 %1556  ;;  %v1403_v8 = vpop.permute.xlu0 %1402 }
 0x127   : > { %v1685_v18 = vsel %vm1680_vm1, %v1676_v17, %v1557_v7  ;;  %v1643_v49 = vsel %vm223_vm0, %v3209_v25, %v1403_v8 }
 0x12a   : > { %v1465_v10 = vpop.permute.xlu1 %1464  ;;  %v1527_v61 = vpop.permute.xlu0 %1526 }
 0x12b   : > { %v1677_v39 = vsel %vm1671_vm15, %v1668_v36, %v1527_v61  ;;  %v1660_v52 = vsel %vm1653_vm13, %v1651_v41, %v1465_v10  ;;  %v2265_v41 = vld [vmem:[%s3733_s3 + $0x18] sm:$0xff] }
 0x12e   : > { %v1589_v55 = vpop.permute.xlu1 %1588  ;;  %v1435_v16 = vpop.permute.xlu0 %1434 }
 0x12f   : > { %v1694_v19 = vsel %vm1689_vm2, %v1685_v18, %v1589_v55  ;;  %v1652_v27 = vsel %vm1644_vm12, %v1643_v49, %v1435_v16  ;;  %v2262_v49 = vld [vmem:[%s3733_s3] sm:$0xff] }
 0x130   : > { %v2631_v51 = vpack.c.bf16 %v2263_v30, %v2262_v49 }
 0x132   : > { %v1497_v13 = vpop.permute.xlu1 %1496  ;;  %2632 = vmatprep.subr.bf16.mxu1 %v2631_v51 }
 0x133   : > { %v1669_v56 = vsel %vm1662_vm14, %v1660_v52, %v1497_v13  ;;  %v1871_v13 = vld [vmem:[#allocation3 + $0x20] sm:$0xff]  ;;  %2634 = vmatpush3.bf16.msra.mxu1 %v2631_v51 }
 0x136   : > { %v1621_v4 = vpop.permute.xlu1 %1620 }
 0x137   : > { %v1703_v44 = vsel %vm1698_vm3, %v1694_v19, %v1621_v4 }
 0x138   : > { %2595 = vmatprep.mubr.msk.f32.mxu0 %vm1719_vm4, %v1703_v44 }
 0x139   : > { %v1559_v5 = vpop.permute.xlu0 %1558 }
 0x13a   : > { %v1529_v21 = vpop.permute.xlu1 %1528  ;;  %v1686_v42 = vsel %vm1680_vm1, %v1677_v39, %v1559_v5 }
 0x13b   : > { %v1678_v33 = vsel %vm1671_vm15, %v1669_v56, %v1529_v21 }
 0x13d   : > { %v1467_v22 = vpop.permute.xlu0 %1466 }
 0x13e   : > { %v1531_v9 = vpop.permute.xlu1 %1530  ;;  %v1661_v31 = vsel %vm1653_vm13, %v1652_v27, %v1467_v22 }
 0x141   : > { %v1591_v24 = vpop.permute.xlu0 %1590 }
 0x142   : > { %v1563_v38 = vpop.permute.xlu1 %1562  ;;  %v1695_v43 = vsel %vm1689_vm2, %v1686_v42, %v1591_v24 }
 0x145   : > { %v1499_v35 = vpop.permute.xlu0 %1498 }
 0x146   : > { %v1595_v37 = vpop.permute.xlu1 %1594  ;;  %v1670_v54 = vsel %vm1662_vm14, %v1661_v31, %v1499_v35  ;;  %v2635_v31 = vpack.c.bf16 %v2265_v41, %v2264_v53 }
 0x147   : > { %v1679_v57 = vsel %vm1671_vm15, %v1670_v54, %v1531_v9 }
 0x148   : > { %v1688_v59 = vsel %vm1680_vm1, %v1679_v57, %v1563_v38  ;;  %2636 = vmatprep.subr.bf16.mxu1 %v2635_v31 }
 0x149   : > { %v1623_v45 = vpop.permute.xlu0 %1622  ;;  %v1697_v1 = vsel %vm1689_vm2, %v1688_v59, %v1595_v37  ;;  %2638 = vmatpush3.bf16.msra.mxu1 %v2635_v31 }
 0x14a   : > { %v1704_v46 = vsel %vm1698_vm3, %v1695_v43, %v1623_v45  ;;  %v1627_v58 = vpop.permute.xlu1 %1626 }
 0x14b   : > { %2596 = vmatmul.mubr.msk.f32.gmra.mrb[4].mxu0 %vm1719_vm4, %v1704_v46  ;;  %v1706_v34 = vsel %vm1698_vm3, %v1697_v1, %v1627_v58  ;;  %v2266_v58 = vld [vmem:[%s3733_s3 + $0x20] sm:$0xf] }
 0x14c   : > { %2609 = vmatprep.subr.msk.mxu1 %vm1744_vm10, %v2266_v58 }
 0x14d   : > { %v1561_v47 = vpop.permute.xlu0 %1560  ;;  %2610 = vmatpush3.msk.msra.mxu1 %vm1744_vm10, %v2266_v58 }
 0x14e   : > { %v1687_v63 = vsel %vm1680_vm1, %v1678_v33, %v1561_v47  ;;  %v1953_v7 = vpop.permute.xlu1 %1952 }
 0x14f   : > { %v2199_v61 = vsel %vm223_vm0, %v1870_v14, %v1953_v7 }
 0x151   : > { %v1593_v25 = vpop.permute.xlu0 %1592 }
 0x152   : > { %v1696_v3 = vsel %vm1689_vm2, %v1687_v63, %v1593_v25  ;;  %v1985_v62 = vpop.permute.xlu1 %1984 }
 0x153   : > { %v3468_v26 = vsel %vm1644_vm12, %v2199_v61, %v1985_v62 }
 0x155   : > { %v1625_v28 = vpop.permute.xlu0 %1624 }
 0x156   : > { %v1705_v40 = vsel %vm1698_vm3, %v1696_v3, %v1625_v28 }
 0x157   : > { %2598 = vmatprep.mubr.msk.f32.mxu0 %vm1719_vm4, %v1705_v40 }
 0x158   : > { %2599 = vmatmul.mubr.msk.f32.gmra.mrb[6].mxu0 %vm1719_vm4, %v1706_v34 }
 0x159   : > { %v3525_v27 = vpop.permute.xlu0 %1950 }
 0x15d   : > { %v3534_v52 = vpop.permute.xlu0 %1982 }
 0x161   : > { %v3547_v1 = vpop.permute.xlu0 %2120 }
 0x16e   : > { %v1955_v15 = vpop.permute.xlu1 %1954 }
 0x16f   : > { %v2200_v16 = vsel %vm223_vm0, %v1871_v13, %v1955_v15 }
 0x17e   : > { %v3556_v28 = vpop.permute.xlu0 %2152 }
 0x183   : > { %v1987_v17 = vpop.permute.xlu1 %1986 }
 0x184   : > { %v3476_v4 = vsel %vm1644_vm12, %v2200_v16, %v1987_v17 }
 0x187   : > { %v3569_v7 = vpop.permute.xlu1 %2124 }
 0x1c8   : > { %v2591_v8 = vpop.f32.mrb[0].mxu0 }
 0x1c9   : > { %v1820_v10 = vadd.f32 %v2591_v8, %v3462_v6  ;;  %v1814_v11 = vpop.f32.mrb[1].mxu0 }
 0x1ca   : > { %v1815_v55 = vadd.f32 %v3462_v6, %v1814_v11 }
 0x1cb   : > { %v1854_v0 = vmax.f32 %v1820_v10, 0.0 }
 0x1cc   : > { %v1853_v12 = vmax.f32 %v1815_v55, 0.0 }
 0x1cd   : > { %1862 = vst.msk [vmem:[#allocation3 + $0x43] sm:$0xff] %vm223_vm0, %v1854_v0 }
 0x1ce   : > { %1861 = vst.msk [vmem:[#allocation3 + $0x33] sm:$0xff] %vm223_vm0, %v1853_v12 }
 0x1d4   : > { %v1902_v18 = vld [vmem:[#allocation3 + $0x43] sm:$0xff] }
 0x1d5   : > { %v3473_v19 = vld [vmem:[#allocation3 + $0x40] sm:$0xff]  ;;  %2048 = vrot.lane.b32.xlu0 %v1902_v18, %s2757_s13  ;;  %v1909_v5 = vld [vmem:[#allocation3 + $0x36] sm:$0xff] }
 0x1d6   : > { %2016 = vrot.lane.b32.xlu1 %v3473_v19, %s2756_s12  ;;  %v1910_v44 = vld [vmem:[#allocation3 + $0x46] sm:$0xff]  ;;  %v3485_v21 = vld [vmem:[#allocation3 + $0x30] sm:$0xff] }
 0x1d7   : > { %v1901_v22 = vld [vmem:[#allocation3 + $0x33] sm:$0xff] }
 0x1d9   : > { %2080 = vrot.lane.b32.xlu0 %v1910_v44, %s2758_s14 }
 0x1da   : > { %1990 = vrot.lane.b32.xlu1 %v1910_v44, %s2754_s10 }
 0x1dd   : > { %1958 = vrot.lane.b32.xlu0 %v1902_v18, %s2755_s11 }
 0x1de   : > { %2078 = vrot.lane.b32.xlu1 %v1909_v5, %s2758_s14 }
 0x1e1   : > { %2014 = vrot.lane.b32.xlu0 %v3485_v21, %s2756_s12 }
 0x1e5   : > { %2046 = vrot.lane.b32.xlu0 %v1901_v22, %s2757_s13 }
 0x1e9   : > { %1956 = vrot.lane.b32.xlu0 %v1901_v22, %s2755_s11  ;;  %v1933_v22 = vld [vmem:[#allocation3 + $0xd3] sm:$0xff] }
 0x1ed   : > { %1988 = vrot.lane.b32.xlu0 %v1909_v5, %s2754_s10 }
 0x1f0   : > { %v2594_v23 = vpop.f32.mrb[2].mxu0 }
 0x1f1   : > { %v1830_v9 = vadd.f32 %v2594_v23, %v3462_v6  ;;  %v1824_v24 = vpop.f32.mrb[3].mxu0  ;;  %v1932_v23 = vld [vmem:[#allocation3 + $0xc3] sm:$0xff] }
 0x1f2   : > { %v1825_v29 = vadd.f32 %v3462_v6, %v1824_v24  ;;  %v1940_v24 = vld [vmem:[#allocation3 + $0xc6] sm:$0xff] }
 0x1f3   : > { %v1856_v20 = vmax.f32 %v1830_v9, 0.0 }
 0x1f4   : > { %v1855_v32 = vmax.f32 %v1825_v29, 0.0 }
 0x1f5   : > { %1864 = vst.msk [vmem:[#allocation3 + $0x63] sm:$0xff] %vm223_vm0, %v1856_v20 }
 0x1f6   : > { %1863 = vst.msk [vmem:[#allocation3 + $0x53] sm:$0xff] %vm223_vm0, %v1855_v32 }
 0x1fc   : > { %v3496_v35 = vld [vmem:[#allocation3 + $0x60] sm:$0xff] }
 0x1fd   : > { %2110 = vrot.lane.b32.xlu1 %v3496_v35, %s2759_s15  ;;  %2020 = vrot.lane.b32.xlu0 %v3496_v35, %s2756_s12  ;;  %v1926_v36 = vld [vmem:[#allocation3 + $0x63] sm:$0xff]  ;;  %v1911_v39 = vld [vmem:[#allocation3 + $0x56] sm:$0xff] }
 0x1fe   : > { %v1912_v38 = vld [vmem:[#allocation3 + $0x66] sm:$0xff]  ;;  %v1882_v42 = vld [vmem:[#allocation3 + $0x53] sm:$0xff] }
 0x1ff   : > { %v3510_v43 = vld [vmem:[#allocation3 + $0x50] sm:$0xff] }
 0x201   : > { %2142 = vrot.lane.b32.xlu1 %v1926_v36, %s2760_s16  ;;  %2084 = vrot.lane.b32.xlu0 %v1912_v38, %s2758_s14 }
 0x205   : > { %2174 = vrot.lane.b32.xlu1 %v1912_v38, %s2761_s17  ;;  %1962 = vrot.lane.b32.xlu0 %v1926_v36, %s2755_s11 }
 0x209   : > { %2052 = vrot.lane.b32.xlu1 %v1926_v36, %s2757_s13  ;;  %2082 = vrot.lane.b32.xlu0 %v1911_v39, %s2758_s14 }
 0x20d   : > { %1994 = vrot.lane.b32.xlu1 %v1912_v38, %s2754_s10  ;;  %1960 = vrot.lane.b32.xlu0 %v1882_v42, %s2755_s11  ;;  %v1941_v38 = vld [vmem:[#allocation3 + $0xd6] sm:$0xff] }
 0x211   : > { %2018 = vrot.lane.b32.xlu1 %v3510_v43, %s2756_s12  ;;  %1992 = vrot.lane.b32.xlu0 %v1911_v39, %s2754_s10  ;;  %v1869_v39 = vld [vmem:[#allocation3] sm:$0xff] }
 0x215   : > { %2050 = vrot.lane.b32.xlu1 %v1882_v42, %s2757_s13 }
 0x21e   : > { %v2597_v45 = vpop.f32.mrb[4].mxu0 }
 0x21f   : > { %v1840_v46 = vadd.f32 %v2597_v45, %v3462_v6  ;;  %v1834_v37 = vpop.f32.mrb[5].mxu0  ;;  %v2198_v45 = vsel %vm223_vm0, %v1869_v39, %v3525_v27 }
 0x220   : > { %v1835_v47 = vadd.f32 %v3462_v6, %v1834_v37 }
 0x221   : > { %v1858_v48 = vmax.f32 %v1840_v46, 0.0 }
 0x222   : > { %v1857_v50 = vmax.f32 %v1835_v47, 0.0 }
 0x223   : > { %1866 = vst.msk [vmem:[#allocation3 + $0x83] sm:$0xff] %vm223_vm0, %v1858_v48 }
 0x224   : > { %1865 = vst.msk [vmem:[#allocation3 + $0x73] sm:$0xff] %vm223_vm0, %v1857_v50 }
 0x22a   : > { %v1920_v54 = vld [vmem:[#allocation3 + $0x80] sm:$0xff] }
 0x22b   : > { %v2600_v25 = vpop.f32.mrb[6].mxu0  ;;  %2114 = vrot.lane.b32.xlu1 %v1920_v54, %s2759_s15  ;;  %2024 = vrot.lane.b32.xlu0 %v1920_v54, %s2756_s12  ;;  %v1928_v60 = vld [vmem:[#allocation3 + $0x83] sm:$0xff]  ;;  %v3551_v3 = vld [vmem:[#allocation3 + $0x70] sm:$0xff] }
 0x22c   : > { %v1850_v56 = vadd.f32 %v2600_v25, %v3462_v6  ;;  %v1844_v57 = vpop.f32.mrb[7].mxu0  ;;  %v1914_v2 = vld [vmem:[#allocation3 + $0x86] sm:$0xff]  ;;  %v1927_v34 = vld [vmem:[#allocation3 + $0x73] sm:$0xff] }
 0x22d   : > { %v1845_v33 = vadd.f32 %v3462_v6, %v1844_v57  ;;  %v1935_v40 = vld [vmem:[#allocation3 + $0x76] sm:$0xff]  ;;  %v3562_v6 = vpop.permute.xlu0 %2184 }
 0x22e   : > { %v1860_v59 = vmax.f32 %v1850_v56, 0.0 }
 0x22f   : > { %v1859_v63 = vmax.f32 %v1845_v33, 0.0  ;;  %2146 = vrot.lane.b32.xlu1 %v1928_v60, %s2760_s16  ;;  %2088 = vrot.lane.b32.xlu0 %v1914_v2, %s2758_s14 }
 0x230   : > { %1868 = vst.msk [vmem:[#allocation3 + $0xa3] sm:$0xff] %vm223_vm0, %v1860_v59 }
 0x231   : > { %1867 = vst.msk [vmem:[#allocation3 + $0x93] sm:$0xff] %vm223_vm0, %v1859_v63  ;;  %v3567_v14 = vpop.permute.xlu0 %2122 }
 0x233   : > { %2178 = vrot.lane.b32.xlu1 %v1914_v2, %s2761_s17  ;;  %2112 = vrot.lane.b32.xlu0 %v3551_v3, %s2759_s15 }
 0x237   : > { %2056 = vrot.lane.b32.xlu1 %v1928_v60, %s2757_s13  ;;  %2144 = vrot.lane.b32.xlu0 %v1927_v34, %s2760_s16  ;;  %v1922_v8 = vld [vmem:[#allocation3 + $0xa0] sm:$0xff] }
 0x238   : > { %v1930_v0 = vld [vmem:[#allocation3 + $0xa3] sm:$0xff]  ;;  %v1921_v15 = vld [vmem:[#allocation3 + $0x90] sm:$0xff] }
 0x239   : > { %v1938_v13 = vld [vmem:[#allocation3 + $0xa6] sm:$0xff]  ;;  %v1929_v44 = vld [vmem:[#allocation3 + $0x93] sm:$0xff] }
 0x23a   : > { %v1937_v29 = vld [vmem:[#allocation3 + $0x96] sm:$0xff] }
 0x23b   : > { %2176 = vrot.lane.b32.xlu1 %v1935_v40, %s2761_s17  ;;  %2086 = vrot.lane.b32.xlu0 %v1935_v40, %s2758_s14 }
 0x23f   : > { %2022 = vrot.lane.b32.xlu1 %v3551_v3, %s2756_s12  ;;  %1964 = vrot.lane.b32.xlu0 %v1927_v34, %s2755_s11 }
 0x243   : > { %2054 = vrot.lane.b32.xlu1 %v1927_v34, %s2757_s13  ;;  %1996 = vrot.lane.b32.xlu0 %v1935_v40, %s2754_s10 }
 0x247   : > { %2118 = vrot.lane.b32.xlu1 %v1922_v8, %s2759_s15  ;;  %2028 = vrot.lane.b32.xlu0 %v1922_v8, %s2756_s12  ;;  %v2049_v10 = vpop.permute.xlu0 %2048 }
 0x248   : > { %v2017_v11 = vpop.permute.xlu1 %2016 }
 0x249   : > { %v2215_v61 = vsel %vm1653_vm13, %v3468_v26, %v2017_v11 }
 0x24a   : > { %v2223_v55 = vsel %vm1662_vm14, %v2215_v61, %v2049_v10 }
 0x24b   : > { %2150 = vrot.lane.b32.xlu1 %v1930_v0, %s2760_s16  ;;  %2060 = vrot.lane.b32.xlu0 %v1930_v0, %s2757_s13  ;;  %v2081_v62 = vpop.permute.xlu0 %2080 }
 0x24c   : > { %v3581_v12 = vsel %vm1671_vm15, %v2223_v55, %v2081_v62  ;;  %v1991_v17 = vpop.permute.xlu1 %1990 }
 0x24f   : > { %2182 = vrot.lane.b32.xlu1 %v1938_v13, %s2761_s17  ;;  %2116 = vrot.lane.b32.xlu0 %v1921_v15, %s2759_s15  ;;  %v1959_v16 = vpop.permute.xlu0 %1958 }
 0x250   : > { %v2202_v26 = vsel %vm223_vm0, %v3473_v19, %v1959_v16  ;;  %v2079_v42 = vpop.permute.xlu1 %2078 }
 0x251   : > { %v3588_v18 = vsel %vm1644_vm12, %v2202_v26, %v1991_v17 }
 0x253   : > { %2092 = vrot.lane.b32.xlu1 %v1938_v13, %s2758_s14  ;;  %2148 = vrot.lane.b32.xlu0 %v1929_v44, %s2760_s16  ;;  %v2015_v5 = vpop.permute.xlu0 %2014 }
 0x257   : > { %2156 = vrot.lane.b32.xlu1 %v1933_v22, %s2760_s16  ;;  %2154 = vrot.lane.b32.xlu0 %v1932_v23, %s2760_s16  ;;  %v2047_v9 = vpop.permute.xlu0 %2046 }
 0x25b   : > { %2180 = vrot.lane.b32.xlu1 %v1937_v29, %s2761_s17  ;;  %2186 = vrot.lane.b32.xlu0 %v1940_v24, %s2761_s17  ;;  %v1957_v19 = vpop.permute.xlu0 %1956 }
 0x25c   : > { %v2201_v20 = vsel %vm223_vm0, %v3485_v21, %v1957_v19  ;;  %v2206_v21 = vsel %vm1644_vm12, %v2198_v45, %v3534_v52 }
 0x25d   : > { %v2214_v48 = vsel %vm1653_vm13, %v2206_v21, %v2015_v5 }
 0x25e   : > { %v2222_v50 = vsel %vm1662_vm14, %v2214_v48, %v2047_v9 }
 0x25f   : > { %2026 = vrot.lane.b32.xlu1 %v1921_v15, %s2756_s12  ;;  %v1989_v32 = vpop.permute.xlu0 %1988  ;;  %v2230_v30 = vsel %vm1671_vm15, %v2222_v50, %v2079_v42  ;;  %s215_s12 = sand.u32 1, %s2742_s19  }
 0x260   : > { %v2209_v36 = vsel %vm1644_vm12, %v2201_v20, %v1989_v32  ;;  %s2449_s23 = scalar_lea.sflag [#allocation5], %s215_s12 }
 0x263   : > { %2058 = vrot.lane.b32.xlu1 %v1929_v44, %s2757_s13  ;;  %s2525_s13 = sshll.u32 %s215_s12, 3 }
 0x264   : > { %s217_s15 = scalar_lea.vmem [#allocation4], %s2525_s13 }
 0x265   : > { %s2462_s16 = sshll.u32 %s217_s15, 4  ;;  %s3690_s16 = int_to_ptr.vmem [resolvable:$true] %s2462_s16 }
 0x266   : > { %s2688_s25 = scalar_lea.vmem %s3690_s16, 128 }
 0x267   : > { %2090 = vrot.lane.b32.xlu1 %v1937_v29, %s2758_s14  ;;  %s2549_s14 = sshll.u32 %s2814_s22, 7  ;;  %p2689_p11 = scmp.ne.s32.totalorder %s3690_s16, %s2688_s25 }
 0x268   : > { %s3688_s9 = scalar_lea.hbm %s3735_s5, %s2549_s14  ;;  %s2762_s22 = smov [#allocation4]  }
 0x269   : > { %p2690_p12 = pnand %p2689_p11, %p2831_p5  ;;  %s2692_s26 = sshll.u32 %s2762_s22, 4  ;;  %s2693_s26 = int_to_ptr.vmem [resolvable:$false] %s2692_s26 }
 0x26a   : > { %s2694_s30 = scalar_lea.vmem %s2693_s26, 256  ;;  %p2695_p0 = scmp.lt.s32.totalorder %s3690_s16, %s2693_s26 }
 0x26b   : > { %2188 = vrot.lane.b32.xlu1 %v1941_v38, %s2761_s17  ;;  %p2691_p13 = pneg %p2690_p12  ;;  %p2696_p1 = scmp.lt.s32.totalorder %s2694_s30, %s2688_s25 }
 0x26d   : > { %p2697_p2 = por %p2696_p1, %p2695_p0 }
 0x26f   : > { %v2111_v46 = vpop.permute.xlu1 %2110  ;;  %v2021_v37 = vpop.permute.xlu0 %2020  ;;  %p2698_p3 = pnand %p2697_p2, %p2691_p13 }
 0x270   : > { %v2217_v47 = vsel %vm1653_vm13, %v2209_v36, %v2021_v37  ;;  %v2238_v51 = vsel %vm1680_vm1, %v2230_v30, %v2111_v46 }
 0x273   : > { %v2143_v49 = vpop.permute.xlu1 %2142  ;;  %v2085_v53 = vpop.permute.xlu0 %2084 }
 0x274   : > { %v2246_v41 = vsel %vm1689_vm2, %v2238_v51, %v2143_v49 }
 0x277   : > { %v2175_v27 = vpop.permute.xlu1 %2174  ;;  %v1963_v54 = vpop.permute.xlu0 %1962 }
 0x278   : > { %v2254_v31 = vsel %vm1698_vm3, %v2246_v41, %v2175_v27  ;;  %v2204_v25 = vsel %vm223_vm0, %v3496_v35, %v1963_v54 }
 0x279   : > { %2611 = vmatprep.mubr.msk.f32.mxu1 %vm1719_vm4, %v2254_v31 }
 0x27b   : > { %v2053_v52 = vpop.permute.xlu1 %2052  ;;  %v2083_v58 = vpop.permute.xlu0 %2082 }
 0x27c   : > { %v2225_v37 = vsel %vm1662_vm14, %v2217_v47, %v2053_v52 }
 0x27f   : > { %v1995_v56 = vpop.permute.xlu1 %1994  ;;  %v1961_v33 = vpop.permute.xlu0 %1960 }
 0x280   : > { %v3618_v57 = vsel %vm1644_vm12, %v2204_v25, %v1995_v56  ;;  %v2203_v36 = vsel %vm223_vm0, %v3510_v43, %v1961_v33  ;;  %v2233_v43 = vsel %vm1671_vm15, %v2225_v37, %v2085_v53 }
 0x283   : > { %v2019_v59 = vpop.permute.xlu1 %2018  ;;  %v1993_v60 = vpop.permute.xlu0 %1992 }
 0x284   : > { %v2216_v61 = vsel %vm1653_vm13, %v3476_v4, %v2019_v59  ;;  %v2211_v38 = vsel %vm1644_vm12, %v2203_v36, %v1993_v60 }
 0x287   : > { %v2051_v2 = vpop.permute.xlu1 %2050 }
 0x288   : > { %v2224_v35 = vsel %vm1662_vm14, %v2216_v61, %v2051_v2 }
 0x289   : > { %v2232_v62 = vsel %vm1671_vm15, %v2224_v35, %v2083_v58 }
 0x29d   : > { %v2115_v63 = vpop.permute.xlu1 %2114  ;;  %v2025_v34 = vpop.permute.xlu0 %2024 }
 0x29e   : > { %v2240_v15 = vsel %vm1680_vm1, %v2232_v62, %v2115_v63  ;;  %v2219_v42 = vsel %vm1653_vm13, %v2211_v38, %v2025_v34 }
 0x2a1   : > { %v2147_v40 = vpop.permute.xlu1 %2146  ;;  %v2089_v8 = vpop.permute.xlu0 %2088 }
 0x2a2   : > { %v2248_v44 = vsel %vm1689_vm2, %v2240_v15, %v2147_v40 }
 0x2a5   : > { %v2179_v10 = vpop.permute.xlu1 %2178  ;;  %v2113_v11 = vpop.permute.xlu0 %2112 }
 0x2a6   : > { %v2239_v13 = vsel %vm1680_vm1, %v3581_v12, %v2113_v11  ;;  %v2256_v4 = vsel %vm1698_vm3, %v2248_v44, %v2179_v10 }
 0x2a9   : > { %v2057_v55 = vpop.permute.xlu1 %2056  ;;  %v2145_v0 = vpop.permute.xlu0 %2144 }
 0x2aa   : > { %v2247_v16 = vsel %vm1689_vm2, %v2239_v13, %v2145_v0  ;;  %v2227_v46 = vsel %vm1662_vm14, %v2219_v42, %v2057_v55 }
 0x2ab   : > { %v2235_v48 = vsel %vm1671_vm15, %v2227_v46, %v2089_v8 }
 0x2ac   : > { %v2243_v51 = vsel %vm1680_vm1, %v2235_v48, %v3547_v1 }
 0x2ad   : > { %v2177_v17 = vpop.permute.xlu1 %2176  ;;  %v2087_v26 = vpop.permute.xlu0 %2086  ;;  %v2251_v1 = vsel %vm1689_vm2, %v2243_v51, %v3556_v28 }
 0x2ae   : > { %v2255_v5 = vsel %vm1698_vm3, %v2247_v16, %v2177_v17  ;;  %v2259_v56 = vsel %vm1698_vm3, %v2251_v1, %v3562_v6 }
 0x2af   : > { %2612 = vmatmul.mubr.msk.f32.vlgmr.msra.gmra.mrb[0].mxu1 %vm1719_vm4, %v2255_v5 }
 0x2b0   : > { %2614 = vmatprep.mubr.msk.f32.mxu1 %vm1719_vm4, %v2256_v4 }
 0x2b1   : > { %v2023_v22 = vpop.permute.xlu1 %2022  ;;  %v1965_v23 = vpop.permute.xlu0 %1964 }
 0x2b2   : > { %v2218_v21 = vsel %vm1653_vm13, %v3588_v18, %v2023_v22  ;;  %v2205_v33 = vsel %vm223_vm0, %v3551_v3, %v1965_v23  ;;  %vm2446_vm0 = vcmask 523264  }
 0x2b5   : > { %v2055_v9 = vpop.permute.xlu1 %2054  ;;  %v1997_v12 = vpop.permute.xlu0 %1996 }
 0x2b6   : > { %v2226_v50 = vsel %vm1662_vm14, %v2218_v21, %v2055_v9  ;;  %v2213_v60 = vsel %vm1644_vm12, %v2205_v33, %v1997_v12 }
 0x2b7   : > { %v2234_v41 = vsel %vm1671_vm15, %v2226_v50, %v2087_v26 }
 0x2b9   : > { %v2119_v24 = vpop.permute.xlu1 %2118  ;;  %v2029_v29 = vpop.permute.xlu0 %2028 }
 0x2ba   : > { %v2242_v47 = vsel %vm1680_vm1, %v2234_v41, %v2119_v24  ;;  %v2221_v2 = vsel %vm1653_vm13, %v2213_v60, %v2029_v29 }
 0x2bd   : > { %v2151_v19 = vpop.permute.xlu1 %2150  ;;  %v2061_v20 = vpop.permute.xlu0 %2060 }
 0x2be   : > { %v2250_v52 = vsel %vm1689_vm2, %v2242_v47, %v2151_v19  ;;  %v2229_v63 = vsel %vm1662_vm14, %v2221_v2, %v2061_v20 }
 0x2c1   : > { %v2183_v32 = vpop.permute.xlu1 %2182  ;;  %v2117_v39 = vpop.permute.xlu0 %2116 }
 0x2c2   : > { %v2241_v27 = vsel %vm1680_vm1, %v2233_v43, %v2117_v39  ;;  %v2258_v25 = vsel %vm1698_vm3, %v2250_v52, %v2183_v32 }
 0x2c5   : > { %v2093_v45 = vpop.permute.xlu1 %2092  ;;  %v2149_v30 = vpop.permute.xlu0 %2148 }
 0x2c6   : > { %v2249_v31 = vsel %vm1689_vm2, %v2241_v27, %v2149_v30  ;;  %v2237_v34 = vsel %vm1671_vm15, %v2229_v63, %v2093_v45 }
 0x2c7   : > { %v2245_v11 = vsel %vm1680_vm1, %v2237_v34, %v3569_v7 }
 0x2c9   : > { %v2157_v49 = vpop.permute.xlu1 %2156  ;;  %v2155_v58 = vpop.permute.xlu0 %2154 }
 0x2ca   : > { %v2253_v35 = vsel %vm1689_vm2, %v2245_v11, %v2157_v49 }
 0x2cd   : > { %v2181_v18 = vpop.permute.xlu1 %2180  ;;  %v2187_v10 = vpop.permute.xlu0 %2186 }
 0x2ce   : > { %v2257_v54 = vsel %vm1698_vm3, %v2249_v31, %v2181_v18 }
 0x2cf   : > { %2615 = vmatmul.mubr.msk.f32.gmra.mrb[2].mxu1 %vm1719_vm4, %v2257_v54 }
 0x2d0   : > { %2617 = vmatprep.mubr.msk.f32.mxu1 %vm1719_vm4, %v2258_v25 }
 0x2d1   : > { %v2027_v53 = vpop.permute.xlu1 %2026 }
 0x2d2   : > { %v2220_v28 = vsel %vm1653_vm13, %v3618_v57, %v2027_v53 }
 0x2d3   : > { %2618 = vmatmul.mubr.msk.f32.gmra.mrb[4].mxu1 %vm1719_vm4, %v2259_v56 }
 0x2d5   : > { %v2059_v59 = vpop.permute.xlu1 %2058 }
 0x2d6   : > { %v2228_v6 = vsel %vm1662_vm14, %v2220_v28, %v2059_v59 }
 0x2d9   : > { %v2091_v40 = vpop.permute.xlu1 %2090 }
 0x2da   : > { %v2236_v8 = vsel %vm1671_vm15, %v2228_v6, %v2091_v40 }
 0x2db   : > { %v2244_v3 = vsel %vm1680_vm1, %v2236_v8, %v3567_v14  ;;  %v2538_v14 = vld [vmem:[%s3734_s4] ss:$0 sm:$0xff] }
 0x2dc   : > { %v2252_v61 = vsel %vm1689_vm2, %v2244_v3, %v2155_v58 }
 0x2dd   : > { %v2260_v57 = vsel %vm1698_vm3, %v2252_v61, %v2187_v10  ;;  %v2189_v55 = vpop.permute.xlu1 %2188 }
 0x2de   : > { %v2261_v0 = vsel %vm1698_vm3, %v2253_v35, %v2189_v55  ;;  %2620 = vmatprep.mubr.msk.f32.mxu1 %vm1719_vm4, %v2260_v57 }
 0x2df   : > { %2621 = vmatmul.mubr.msk.f32.gmra.mrb[6].mxu1 %vm1719_vm4, %v2261_v0 }
 0x382   : > { %v2613_v62 = vpop.f32.mrb[0].mxu1 }
 0x383   : > { %v2367_v13 = vpop.f32.mrb[1].mxu1  ;;  %v2373_v15 = vadd.f32 %v2613_v62, %v2538_v14 }
 0x384   : > { %v2368_v7 = vadd.f32 %v2538_v14, %v2367_v13 }
 0x385   : > { %v2407_v17 = vmax.f32 %v2373_v15, 0.0 }
 0x386   : > { %v2406_v16 = vmax.f32 %v2368_v7, 0.0 }
 0x388   : > { %2414 = vxpose.xlu0.b32.start [1/8] (short) (narrow) %v2406_v16, 8 }
 0x38c   : > { %2415 = vxpose.xlu0.b32.cont [2/8] (short) (narrow) %v2407_v17, 8 }
 0x3a2   : > { %v2616_v26 = vpop.f32.mrb[2].mxu1 }
 0x3a3   : > { %v2377_v44 = vpop.f32.mrb[3].mxu1  ;;  %v2383_v4 = vadd.f32 %v2616_v26, %v2538_v14 }
 0x3a4   : > { %v2378_v5 = vadd.f32 %v2538_v14, %v2377_v44 }
 0x3a5   : > { %v2409_v12 = vmax.f32 %v2383_v4, 0.0 }
 0x3a6   : > { %v2408_v22 = vmax.f32 %v2378_v5, 0.0  ;;  %v2619_v23 = vpop.f32.mrb[4].mxu1 }
 0x3a7   : > { %v2387_v9 = vpop.f32.mrb[5].mxu1  ;;  %v2393_v29 = vadd.f32 %v2619_v23, %v2538_v14 }
 0x3a8   : > { %2416 = vxpose.xlu0.b32.cont [3/8] (short) (narrow) %v2408_v22, 8  ;;  %v2388_v24 = vadd.f32 %v2538_v14, %v2387_v9 }
 0x3a9   : > { %v2411_v20 = vmax.f32 %v2393_v29, 0.0 }
 0x3aa   : > { %v2410_v19 = vmax.f32 %v2388_v24, 0.0 }
 0x3ac   : > { %2417 = vxpose.xlu0.b32.cont [4/8] (short) (narrow) %v2409_v12, 8 }
 0x3b0   : > { %2418 = vxpose.xlu0.b32.cont [5/8] (short) (narrow) %v2410_v19, 8 }
 0x3b2   : > { %v2622_v32 = vpop.f32.mrb[6].mxu1 }
 0x3b3   : > { %v2397_v36 = vpop.f32.mrb[7].mxu1  ;;  %v2403_v39 = vadd.f32 %v2622_v32, %v2538_v14 }
 0x3b4   : > { %v2398_v38 = vadd.f32 %v2538_v14, %v2397_v36  ;;  %2419 = vxpose.xlu0.b32.cont [6/8] (short) (narrow) %v2411_v20, 8 }
 0x3b5   : > { %v2413_v45 = vmax.f32 %v2403_v39, 0.0 }
 0x3b6   : > { %v2412_v42 = vmax.f32 %v2398_v38, 0.0 }
 0x3b8   : > { %2420 = vxpose.xlu0.b32.cont [7/8] (short) (narrow) %v2412_v42, 8 }
 0x3bc   : > { %2421 = vxpose.xlu0.b32.end [8/8] (short) (narrow) %v2413_v45, 8 }
 0x420   : > { %v2430_v46 = vpop.trf.xlu0 }
 0x421   : > { %2447 = vst.msk [vmem:[%s217_s15] sm:$0xff] %vm2446_vm0, %v2430_v46 }
 0x422   : > { %2701 = shalt.err (!%p2698_p3)
}
 0x423   : > { %s2702_s6 = scalar_lea.hbm %s3688_s9, 128  ;;  %s2706_s11 = scalar_lea.hbm %s3735_s5, 256 }
 0x424   : > { %p2703_p4 = scmp.ne.s32.totalorder %s3688_s9, %s2702_s6  ;;  %p2707_p9 = scmp.lt.u32.totalorder %s3688_s9, %s3735_s5 }
 0x425   : > { %p2708_p10 = scmp.lt.u32.totalorder %s2706_s11, %s2702_s6  ;;  %p2710_p12 = scmp.lt.u32.totalorder %s2702_s6, %s3688_s9 }
 0x426   : > { %p2704_p7 = pnand %p2703_p4, %p2831_p5 }
 0x427   : > { %p2709_p11 = por %p2708_p10, %p2707_p9 }
 0x428   : > { %p2705_p8 = pneg %p2704_p7 }
 0x429   : > { %p2711_p13 = por %p2710_p12, %p2709_p11 }
 0x42b   : > { %p2712_p0 = pnand %p2711_p13, %p2705_p8 }
 0x42d   : > { %2715 = shalt.err (!%p2712_p0)
}
 0x42e   : > { %2639 = dma.vmem_to_hbm [thread:$0]  (%p2831_p5), %s3690_s16, 128, %s3688_s9, %s2449_s23  }
 0x42f PF: > { %p2645_p1 = scmp.ge.s32.totalorder %s2750_s21, 2  ;;  %s2474_s14 = sand.u32 1, %s2738_s18  }
 0x430   : > { %s2475_s15 = scalar_lea.sflag [#allocation5], %s2474_s14 }
 0x431   : > { %p2642_p2 = pnand %p2645_p1, %p2835_p6 }
 0x433   : > { %2733 = dma.done.wait (!%p2642_p2), %s2475_s15, 128  }
 0x434   : > { %2735 = vsyncadd (!%p2642_p2), %s2475_s15, 4294967168  ;;  %p15_p3 = scmp.ge.s32.totalorder %s2818_s24, 4   ;;  %s3738_s18 = smov %s2742_s19 }
 0x435   : > { %s3739_s19 = smov %s2746_s20  ;;  %s3740_s20 = smov %s2829_s27 }
 0x436   : > { %s3741_s21 = smov %s2818_s24  ;;  %17 = sbr.rel (!%p15_p3) target bundleno = 3 (0x3), region = 81 }
 0x43d   :  { %2480 = vsyncpa [#allocation5], 1 }
 0x43e   :  { %2482 = vsyncpa [#allocation5 + $0x1], 1 }

</bundles_post_ra>
